<compile_context>
chip_gen: v7x
topology: tpu7x:2x2x1
jax: 0.10.0
libtpu: 0.0.40
codegen_flags: <defaults>
</compile_context>

<pallas_src>
import jax
import jax.numpy as jnp
from jax.experimental import pallas as pl
from jax.experimental.pallas import tpu as pltpu

# Matmul operand dtype.  f32 is the safe cross-generation default (v5e VPU has no
# bf16) and keeps the 5e-4 test tolerance; switch to jnp.bfloat16 on v6e/v7x for
# higher MXU throughput once tolerances are widened (accumulation stays f32).
MXU_DTYPE = jnp.float32


def _images_per_step(n_batch):
    """Images folded into lanes per grid step.

    v5e/v6e have a single TensorCore -> fold the whole batch (1 grid step).
    v7x has 2 TensorCores -> keep >= 2 parallel grid steps when the batch allows.
    """
    try:
        kind = jax.devices()[0].device_kind.lower()
        multi_core = "v7" in kind
    except Exception:  # defensive: never let device probing break the wrapper
        multi_core = False
    if multi_core and n_batch >= 2 and n_batch % 2 == 0:
        return n_batch // 2
    return n_batch


def block_forward(x_nchw, kp, *, kernel_size=3, images_per_step=None):
    """Block forward.  x_nchw: (N, Cin, H, W) f32 (PyTorch layout) -> (N, Cout, H, W)."""
    N, Cin, H, W = x_nchw.shape
    HW = H * W
    E = kp["b1"].shape[0]            # expand_size
    Eh = kp["b2"].shape[0]           # expand_size // 2
    Cout = kp["bout"].shape[0]
    K = kernel_size
    pad2 = K // 2

    NB = images_per_step if images_per_step is not None else _images_per_step(N)
    if N % NB != 0:
        NB = 1                       # always-valid fallback
    G = N // NB
    NBHW = NB * HW

    # Per-image lane segment: [LSEG zeroed halo][HW interior] ... plus one trailing
    # halo.  LSEG is a lane-tile multiple so interior stores stay aligned, and the
    # gap between images is wide enough for every 3x3 / KxK shifted read.
    LSEG = 128
    assert LSEG >= max(1, pad2) * (W + 1), "halo too small for this kernel size"
    SEG = HW + LSEG
    PADW = LSEG + NB * SEG

    def start(i):                    # first interior lane of image i
        return LSEG + i * SEG

    def mm(a, b):
        return jnp.dot(a.astype(MXU_DTYPE), b.astype(MXU_DTYPE),
                       preferred_element_type=jnp.float32)

    conv4_offsets = (-1, 0, 1)                       # conv4 is a fixed 3x3
    conv2_offsets = tuple(range(-pad2, pad2 + 1))    # depthwise KxK

    def kernel(x_ref, w1sc_ref, b1_ref, w4_ref, w2_ref, b2_ref, w3_ref, bout_ref,
               o_ref, xw_ref, a1_ref, stk_ref, a2_ref, cat_ref):
        # ---- hoisted W-boundary masks (one broadcast each, reused in loops) ----
        col = jax.lax.broadcasted_iota(jnp.int32, (1, HW), 1) % W

        def masks(rows, offsets):
            return {d: jnp.broadcast_to(
                        jnp.logical_and(col + d >= 0, col + d < W), (rows, HW))
                    for d in offsets if d != 0}

        mask_E = masks(E, conv4_offsets)
        mask_Eh = masks(Eh, conv2_offsets)

        # ---- zero only the halo/gap lanes of the padded scratch activations ----
        # (scratch is uninitialized; interior stores never touch these lanes)
        for i in range(NB + 1):
            g0 = i * SEG
            a1_ref[:, g0:g0 + LSEG] = jnp.zeros((E, LSEG), jnp.float32)
            a2_ref[:, g0:g0 + LSEG] = jnp.zeros((Eh, LSEG), jnp.float32)

        # ---- lay the NB images side by side on lanes: (Cin, NB*HW) -------------
        for i in range(NB):
            xw_ref[:, i * HW:(i + 1) * HW] = x_ref[i]

        # ---- conv1 (1x1) + bn1 + ReLU, fused with the 1x1 shortcut -------------
        # w1sc = [s1*W1 ; ssc*Wsc] -> (E + Cout, Cin); one MXU push, RHS = NB*HW.
        y = mm(w1sc_ref[...], xw_ref[...])                  # (E + Cout, NB*HW)
        out1 = jnp.maximum(y[:E] + b1_ref[...], 0.0)        # (E, NB*HW)
        sc = y[E:]                                          # (Cout, NB*HW); bias in bout

        for i in range(NB):                                 # aligned interior stores
            a1_ref[:, start(i):start(i) + HW] = out1[:, i * HW:(i + 1) * HW]

        # ---- conv4: dense 3x3 (stride 1, pad 1), E -> Eh, as ONE matmul --------
        # Stack the 9 shifted windows on sublanes -> (9*E, NB*HW), single K=9*E
        # contraction (no per-tap MXU pushes, no result-FIFO pop serialization).
        for dy in conv4_offsets:
            for dx in conv4_offsets:
                t = (dy + 1) * 3 + (dx + 1)
                for i in range(NB):
                    s0 = start(i) + dy * W + dx
                    v = a1_ref[:, s0:s0 + HW]
                    if dx != 0:
                        v = jnp.where(mask_E[dx], v, 0.0)
                    stk_ref[t * E:(t + 1) * E, i * HW:(i + 1) * HW] = v
        acc2 = mm(w4_ref[...], stk_ref[...])                # (Eh, NB*HW) == out2

        cat_ref[0:Eh, :] = acc2                             # conv3 LHS rows [0:Eh]
        for i in range(NB):                                 # padded copy for depthwise
            a2_ref[:, start(i):start(i) + HW] = acc2[:, i * HW:(i + 1) * HW]

        # ---- conv2: depthwise KxK (stride 1) + bn2 bias + ReLU (pure VPU) ------
        for i in range(NB):
            acc3 = None
            for ky in range(K):
                for kx in range(K):
                    dy, dx = ky - pad2, kx - pad2
                    s0 = start(i) + dy * W + dx
                    v = a2_ref[:, s0:s0 + HW]
                    if dx != 0:
                        v = jnp.where(mask_Eh[dx], v, 0.0)
                    c = v * w2_ref[ky * K + kx]             # (Eh, 1) tap weight column
                    acc3 = c if acc3 is None else acc3 + c
            out3 = jnp.maximum(acc3 + b2_ref[...], 0.0)     # (Eh, HW)
            cat_ref[Eh:2 * Eh, i * HW:(i + 1) * HW] = out3

        # ---- conv3 (1x1 on [out2 ; out3]) + bn3, + shortcut ---------------------
        out = mm(w3_ref[...], cat_ref[...]) + sc + bout_ref[...]   # (Cout, NB*HW)

        # Fully lane-dense output stores (Cout sublanes x HW lanes per image).
        for i in range(NB):
            o_ref[i] = out[:, i * HW:(i + 1) * HW].astype(o_ref.dtype)

    params = (kp["w1sc"], kp["b1"], kp["w4"], kp["w2"], kp["b2"], kp["w3"],
              kp["bout"])

    def const_spec(a):
        nd = a.ndim
        return pl.BlockSpec(a.shape, lambda g, _nd=nd: (0,) * _nd)

    grid_spec = pltpu.PrefetchScalarGridSpec(
        num_scalar_prefetch=0,
        grid=(G,),
        in_specs=[pl.BlockSpec((NB, Cin, HW), lambda g: (g, 0, 0))]
                 + [const_spec(p) for p in params],
        out_specs=pl.BlockSpec((NB, Cout, HW), lambda g: (g, 0, 0)),
        scratch_shapes=[
            pltpu.VMEM((Cin, NBHW), jnp.float32),       # x, images side by side
            pltpu.VMEM((E, PADW), jnp.float32),         # out1, halo-padded
            pltpu.VMEM((9 * E, NBHW), jnp.float32),     # stacked conv4 RHS (9*E rows)
            pltpu.VMEM((Eh, PADW), jnp.float32),        # out2, halo-padded
            pltpu.VMEM((2 * Eh, NBHW), jnp.float32),    # [out2 ; out3] for conv3
        ],
    )

    x_flat = x_nchw.reshape(N, Cin, HW)                 # contiguous (free) reshape
    out = pl.pallas_call(
        kernel,
        out_shape=jax.ShapeDtypeStruct((N, Cout, HW), x_nchw.dtype),
        grid_spec=grid_spec,
        compiler_params=pltpu.CompilerParams(
            dimension_semantics=("parallel",)),
    )(x_flat, *params)
    return out.reshape(N, Cout, H, W)                   # contiguous (free) reshape


# --------------------------- parameter setup ---------------------------------
def fold_bn(gamma, beta, mean, var, eps=1e-5):
    scale = gamma / jnp.sqrt(var + eps)
    bias = beta - mean * scale
    return scale, bias


def make_params(key, in_size, expand_size, out_size, kernel_size):
    Eh = expand_size // 2
    ks = jax.random.split(key, 9)

    def bn_params(k, c):
        k1, k2, k3, k4 = jax.random.split(k, 4)
        gamma = 1.0 + 0.2 * jax.random.normal(k1, (c,), jnp.float32)
        beta = 0.1 * jax.random.normal(k2, (c,), jnp.float32)
        mean = 0.1 * jax.random.normal(k3, (c,), jnp.float32)
        var = 0.5 + jax.random.uniform(k4, (c,), jnp.float32)
        return gamma, beta, mean, var

    # PyTorch-layout (OIHW) weights
    w1_t = 0.2 * jax.random.normal(ks[0], (expand_size, in_size, 1, 1), jnp.float32)
    w4_t = 0.2 * jax.random.normal(ks[1], (Eh, expand_size, 3, 3), jnp.float32)
    w2_t = 0.2 * jax.random.normal(ks[2], (Eh, 1, kernel_size, kernel_size), jnp.float32)
    w3_t = 0.2 * jax.random.normal(ks[3], (out_size, expand_size, 1, 1), jnp.float32)
    wsc_t = 0.2 * jax.random.normal(ks[4], (out_size, in_size, 1, 1), jnp.float32)

    bn1 = bn_params(ks[5], expand_size)
    bn2 = bn_params(ks[6], Eh)
    bn3 = bn_params(ks[7], out_size)
    bnsc = bn_params(ks[8], out_size)

    torch_params = dict(w1=w1_t, w4=w4_t, w2=w2_t, w3=w3_t, wsc=wsc_t,
                        bn1=bn1, bn2=bn2, bn3=bn3, bnsc=bnsc)

    # Kernel-layout params: BN scales folded into weights, only biases remain.
    s1, b1 = fold_bn(*bn1)
    s2, b2 = fold_bn(*bn2)
    s3, b3 = fold_bn(*bn3)
    ssc, bsc = fold_bn(*bnsc)

    K = kernel_size
    W1 = w1_t[:, :, 0, 0] * s1[:, None]                       # (E, Cin)
    Wsc = wsc_t[:, :, 0, 0] * ssc[:, None]                    # (Cout, Cin)
    kp = dict(
        w1sc=jnp.concatenate([W1, Wsc], axis=0),               # (E + Cout, Cin)
        # conv4 taps stacked along the contraction axis: (Eh, 9*E); column block
        # t*E:(t+1)*E holds tap (ky, kx) with t = ky*3 + kx.
        w4=jnp.transpose(w4_t, (0, 2, 3, 1)).reshape(Eh, 9 * expand_size),
        # depthwise weights as per-tap sublane columns: (K*K, Eh, 1)
        w2=jnp.transpose(w2_t[:, 0, :, :] * s2[:, None, None],
                         (1, 2, 0)).reshape(K * K, Eh)[:, :, None],
        w3=w3_t[:, :, 0, 0] * s3[:, None],                     # (Cout, 2*Eh)
        b1=b1[:, None],                                        # (E, 1)
        b2=b2[:, None],                                        # (Eh, 1)
        bout=(b3 + bsc)[:, None],                              # (Cout, 1)
    )
    return torch_params, kp


# --------------------------- pure-JAX reference -------------------------------
def _conv_nchw(x, w_oihw, stride, padding, groups=1):
    return jax.lax.conv_general_dilated(
        x, w_oihw, (stride, stride), [(padding, padding), (padding, padding)],
        dimension_numbers=("NCHW", "OIHW", "NCHW"),
        feature_group_count=groups)


def reference_forward(x, tp, kernel_size):
    def bn(y, p):
        s, b = fold_bn(*p)
        return y * s[None, :, None, None] + b[None, :, None, None]

    out1 = jax.nn.relu(bn(_conv_nchw(x, tp["w1"], 1, 0), tp["bn1"]))
    out2 = _conv_nchw(out1, tp["w4"], 1, 1)
    out3 = jax.nn.relu(bn(
        _conv_nchw(out2, tp["w2"], 1, kernel_size // 2, groups=tp["w2"].shape[0]),
        tp["bn2"]))
    out4 = jnp.concatenate([out2, out3], axis=1)
    out = bn(_conv_nchw(out4, tp["w3"], 1, 0), tp["bn3"])
    sc = bn(_conv_nchw(x, tp["wsc"], 1, 0), tp["bnsc"])
    return out + sc


# -------------------------------------------------------------------------------
if __name__ == "__main__":
    N, Cin, H, W = 2, 4, 16, 16
    expand_size, out_size, kernel_size = 16, 8, 3

    key = jax.random.PRNGKey(0)
    kx, kp_key = jax.random.split(key)
    x_nchw = jax.random.normal(kx, (N, Cin, H, W), jnp.float32)   # PyTorch NCHW layout

    torch_params, kernel_params = make_params(kp_key, Cin, expand_size,
                                              out_size, kernel_size)

    out = block_forward(x_nchw, kernel_params, kernel_size=kernel_size)
    out = jax.block_until_ready(out)

    ref = reference_forward(x_nchw, torch_params, kernel_size)
    assert out.shape == (N, out_size, H, W)
    max_err = float(jnp.max(jnp.abs(out - ref)))
    assert jnp.allclose(out, ref, rtol=5e-4, atol=5e-4), max_err

    print("KERNEL_OK")
</pallas_src>

<mosaic_0001>
module attributes {stable_mosaic.version = 11 : i64} {
  func.func @kernel(%arg0: i32, %arg1: memref<2x4x256xf32, #tpu.memory_space<vmem>>, %arg2: memref<24x4xf32, #tpu.memory_space<vmem>>, %arg3: memref<16x1xf32, #tpu.memory_space<vmem>>, %arg4: memref<8x144xf32, #tpu.memory_space<vmem>>, %arg5: memref<9x8x1xf32, #tpu.memory_space<vmem>>, %arg6: memref<8x1xf32, #tpu.memory_space<vmem>>, %arg7: memref<8x16xf32, #tpu.memory_space<vmem>>, %arg8: memref<8x1xf32, #tpu.memory_space<vmem>>, %arg9: memref<2x8x256xf32, #tpu.memory_space<vmem>>, %arg10: memref<4x512xf32, #tpu.memory_space<vmem>>, %arg11: memref<16x896xf32, #tpu.memory_space<vmem>>, %arg12: memref<144x512xf32, #tpu.memory_space<vmem>>, %arg13: memref<8x896xf32, #tpu.memory_space<vmem>>, %arg14: memref<16x512xf32, #tpu.memory_space<vmem>>) attributes {dimension_semantics = [#tpu.dimension_semantics<parallel>], iteration_bounds = array<i64: 1>, scalar_prefetch = 0 : i64, scratch_operands = 5 : i64, tpu.core_type = #tpu.core_type<tc>, window_params = [{transform_indices = @transform_0, window_bounds = array<i64: 2, 4, 256>}, {pipeline_mode = #tpu.pipeline_mode<synchronous>, transform_indices = @transform_1, window_bounds = array<i64: 24, 4>}, {pipeline_mode = #tpu.pipeline_mode<synchronous>, transform_indices = @transform_2, window_bounds = array<i64: 16, 1>}, {pipeline_mode = #tpu.pipeline_mode<synchronous>, transform_indices = @transform_3, window_bounds = array<i64: 8, 144>}, {pipeline_mode = #tpu.pipeline_mode<synchronous>, transform_indices = @transform_4, window_bounds = array<i64: 9, 8, 1>}, {pipeline_mode = #tpu.pipeline_mode<synchronous>, transform_indices = @transform_5, window_bounds = array<i64: 8, 1>}, {pipeline_mode = #tpu.pipeline_mode<synchronous>, transform_indices = @transform_6, window_bounds = array<i64: 8, 16>}, {pipeline_mode = #tpu.pipeline_mode<synchronous>, transform_indices = @transform_7, window_bounds = array<i64: 8, 1>}, {transform_indices = @transform_8, window_bounds = array<i64: 2, 8, 256>}]} {
    %0 = tpu.iota {dimensions = array<i32: 1>} : vector<1x256xi32>
    %c16_i32 = arith.constant 16 : i32
    %c0_i32 = arith.constant 0 : i32
    %1 = arith.cmpi eq, %c16_i32, %c0_i32 : i32
    %c1_i32 = arith.constant 1 : i32
    %2 = arith.select %1, %c1_i32, %c16_i32 : i32
    %3 = vector.broadcast %2 : i32 to vector<1x256xi32>
    %4 = arith.remsi %0, %3 : vector<1x256xi32>
    %c0_i32_0 = arith.constant 0 : i32
    %5 = vector.broadcast %c0_i32_0 : i32 to vector<1x256xi32>
    %6 = arith.cmpi ne, %4, %5 : vector<1x256xi32>
    %c0_i32_1 = arith.constant 0 : i32
    %7 = vector.broadcast %c0_i32_1 : i32 to vector<1x256xi32>
    %8 = arith.cmpi slt, %4, %7 : vector<1x256xi32>
    %c0_i32_2 = arith.constant 0 : i32
    %9 = arith.cmpi slt, %2, %c0_i32_2 : i32
    %10 = vector.broadcast %9 : i1 to vector<1x256xi1>
    %11 = vector.broadcast %10 : vector<1x256xi1> to vector<1x256xi1>
    %12 = arith.xori %8, %11 : vector<1x256xi1>
    %13 = arith.andi %12, %6 : vector<1x256xi1>
    %14 = vector.broadcast %2 : i32 to vector<1x256xi32>
    %15 = arith.addi %4, %14 : vector<1x256xi32>
    %16 = arith.select %13, %15, %4 : vector<1x256xi1>, vector<1x256xi32>
    %c-1_i32 = arith.constant -1 : i32
    %17 = vector.broadcast %c-1_i32 : i32 to vector<1x256xi32>
    %18 = arith.addi %16, %17 : vector<1x256xi32>
    %c0_i32_3 = arith.constant 0 : i32
    %19 = vector.broadcast %c0_i32_3 : i32 to vector<1x256xi32>
    %20 = arith.cmpi sge, %18, %19 : vector<1x256xi32>
    %c-1_i32_4 = arith.constant -1 : i32
    %21 = vector.broadcast %c-1_i32_4 : i32 to vector<1x256xi32>
    %22 = arith.addi %16, %21 : vector<1x256xi32>
    %c16_i32_5 = arith.constant 16 : i32
    %23 = vector.broadcast %c16_i32_5 : i32 to vector<1x256xi32>
    %24 = arith.cmpi slt, %22, %23 : vector<1x256xi32>
    %25 = arith.andi %20, %24 : vector<1x256xi1>
    %26 = vector.shape_cast %25 : vector<1x256xi1> to vector<1x256xi1>
    %27 = vector.broadcast %26 : vector<1x256xi1> to vector<16x256xi1>
    %c1_i32_6 = arith.constant 1 : i32
    %28 = vector.broadcast %c1_i32_6 : i32 to vector<1x256xi32>
    %29 = arith.addi %16, %28 : vector<1x256xi32>
    %c0_i32_7 = arith.constant 0 : i32
    %30 = vector.broadcast %c0_i32_7 : i32 to vector<1x256xi32>
    %31 = arith.cmpi sge, %29, %30 : vector<1x256xi32>
    %c1_i32_8 = arith.constant 1 : i32
    %32 = vector.broadcast %c1_i32_8 : i32 to vector<1x256xi32>
    %33 = arith.addi %16, %32 : vector<1x256xi32>
    %c16_i32_9 = arith.constant 16 : i32
    %34 = vector.broadcast %c16_i32_9 : i32 to vector<1x256xi32>
    %35 = arith.cmpi slt, %33, %34 : vector<1x256xi32>
    %36 = arith.andi %31, %35 : vector<1x256xi1>
    %37 = vector.shape_cast %36 : vector<1x256xi1> to vector<1x256xi1>
    %38 = vector.broadcast %37 : vector<1x256xi1> to vector<16x256xi1>
    %c-1_i32_10 = arith.constant -1 : i32
    %39 = vector.broadcast %c-1_i32_10 : i32 to vector<1x256xi32>
    %40 = arith.addi %16, %39 : vector<1x256xi32>
    %c0_i32_11 = arith.constant 0 : i32
    %41 = vector.broadcast %c0_i32_11 : i32 to vector<1x256xi32>
    %42 = arith.cmpi sge, %40, %41 : vector<1x256xi32>
    %c-1_i32_12 = arith.constant -1 : i32
    %43 = vector.broadcast %c-1_i32_12 : i32 to vector<1x256xi32>
    %44 = arith.addi %16, %43 : vector<1x256xi32>
    %c16_i32_13 = arith.constant 16 : i32
    %45 = vector.broadcast %c16_i32_13 : i32 to vector<1x256xi32>
    %46 = arith.cmpi slt, %44, %45 : vector<1x256xi32>
    %47 = arith.andi %42, %46 : vector<1x256xi1>
    %48 = vector.shape_cast %47 : vector<1x256xi1> to vector<1x256xi1>
    %49 = vector.broadcast %48 : vector<1x256xi1> to vector<8x256xi1>
    %c1_i32_14 = arith.constant 1 : i32
    %50 = vector.broadcast %c1_i32_14 : i32 to vector<1x256xi32>
    %51 = arith.addi %16, %50 : vector<1x256xi32>
    %c0_i32_15 = arith.constant 0 : i32
    %52 = vector.broadcast %c0_i32_15 : i32 to vector<1x256xi32>
    %53 = arith.cmpi sge, %51, %52 : vector<1x256xi32>
    %c1_i32_16 = arith.constant 1 : i32
    %54 = vector.broadcast %c1_i32_16 : i32 to vector<1x256xi32>
    %55 = arith.addi %16, %54 : vector<1x256xi32>
    %c16_i32_17 = arith.constant 16 : i32
    %56 = vector.broadcast %c16_i32_17 : i32 to vector<1x256xi32>
    %57 = arith.cmpi slt, %55, %56 : vector<1x256xi32>
    %58 = arith.andi %53, %57 : vector<1x256xi1>
    %59 = vector.shape_cast %58 : vector<1x256xi1> to vector<1x256xi1>
    %60 = vector.broadcast %59 : vector<1x256xi1> to vector<8x256xi1>
    %cst = arith.constant 0.000000e+00 : f32
    %61 = vector.broadcast %cst : f32 to vector<16x128xf32>
    %c0 = arith.constant 0 : index
    %c0_18 = arith.constant 0 : index
    %62 = vector.load %arg11[%c0, %c0_18] : memref<16x896xf32, #tpu.memory_space<vmem>>, vector<16x128xf32>
    tpu.vector_store %arg11[%c0, %c0_18], %61 {strides = array<i32>} : memref<16x896xf32, #tpu.memory_space<vmem>>, vector<16x128xf32>,
    %cst_19 = arith.constant 0.000000e+00 : f32
    %63 = vector.broadcast %cst_19 : f32 to vector<8x128xf32>
    %c0_20 = arith.constant 0 : index
    %c0_21 = arith.constant 0 : index
    %64 = vector.load %arg13[%c0_20, %c0_21] : memref<8x896xf32, #tpu.memory_space<vmem>>, vector<8x128xf32>
    tpu.vector_store %arg13[%c0_20, %c0_21], %63 {strides = array<i32>} : memref<8x896xf32, #tpu.memory_space<vmem>>, vector<8x128xf32>,
    %cst_22 = arith.constant 0.000000e+00 : f32
    %65 = vector.broadcast %cst_22 : f32 to vector<16x128xf32>
    %c0_23 = arith.constant 0 : index
    %c384 = arith.constant 384 : index
    %66 = vector.load %arg11[%c0_23, %c384] : memref<16x896xf32, #tpu.memory_space<vmem>>, vector<16x128xf32>
    tpu.vector_store %arg11[%c0_23, %c384], %65 {strides = array<i32>} : memref<16x896xf32, #tpu.memory_space<vmem>>, vector<16x128xf32>,
    %cst_24 = arith.constant 0.000000e+00 : f32
    %67 = vector.broadcast %cst_24 : f32 to vector<8x128xf32>
    %c0_25 = arith.constant 0 : index
    %c384_26 = arith.constant 384 : index
    %68 = vector.load %arg13[%c0_25, %c384_26] : memref<8x896xf32, #tpu.memory_space<vmem>>, vector<8x128xf32>
    tpu.vector_store %arg13[%c0_25, %c384_26], %67 {strides = array<i32>} : memref<8x896xf32, #tpu.memory_space<vmem>>, vector<8x128xf32>,
    %cst_27 = arith.constant 0.000000e+00 : f32
    %69 = vector.broadcast %cst_27 : f32 to vector<16x128xf32>
    %c0_28 = arith.constant 0 : index
    %c768 = arith.constant 768 : index
    %70 = vector.load %arg11[%c0_28, %c768] : memref<16x896xf32, #tpu.memory_space<vmem>>, vector<16x128xf32>
    tpu.vector_store %arg11[%c0_28, %c768], %69 {strides = array<i32>} : memref<16x896xf32, #tpu.memory_space<vmem>>, vector<16x128xf32>,
    %cst_29 = arith.constant 0.000000e+00 : f32
    %71 = vector.broadcast %cst_29 : f32 to vector<8x128xf32>
    %c0_30 = arith.constant 0 : index
    %c768_31 = arith.constant 768 : index
    %72 = vector.load %arg13[%c0_30, %c768_31] : memref<8x896xf32, #tpu.memory_space<vmem>>, vector<8x128xf32>
    tpu.vector_store %arg13[%c0_30, %c768_31], %71 {strides = array<i32>} : memref<8x896xf32, #tpu.memory_space<vmem>>, vector<8x128xf32>,
    %c0_32 = arith.constant 0 : index
    %c0_33 = arith.constant 0 : index
    %c0_34 = arith.constant 0 : index
    %73 = vector.load %arg1[%c0_32, %c0_33, %c0_34] : memref<2x4x256xf32, #tpu.memory_space<vmem>>, vector<1x4x256xf32>
    %74 = vector.shape_cast %73 : vector<1x4x256xf32> to vector<4x256xf32>
    %c0_35 = arith.constant 0 : index
    %c0_36 = arith.constant 0 : index
    %75 = vector.load %arg10[%c0_35, %c0_36] : memref<4x512xf32, #tpu.memory_space<vmem>>, vector<4x256xf32>
    tpu.vector_store %arg10[%c0_35, %c0_36], %74 {strides = array<i32>} : memref<4x512xf32, #tpu.memory_space<vmem>>, vector<4x256xf32>,
    %c1 = arith.constant 1 : index
    %c0_37 = arith.constant 0 : index
    %c0_38 = arith.constant 0 : index
    %76 = vector.load %arg1[%c1, %c0_37, %c0_38] : memref<2x4x256xf32, #tpu.memory_space<vmem>>, vector<1x4x256xf32>
    %77 = vector.shape_cast %76 : vector<1x4x256xf32> to vector<4x256xf32>
    %c0_39 = arith.constant 0 : index
    %c256 = arith.constant 256 : index
    %78 = vector.load %arg10[%c0_39, %c256] : memref<4x512xf32, #tpu.memory_space<vmem>>, vector<4x256xf32>
    tpu.vector_store %arg10[%c0_39, %c256], %77 {strides = array<i32>} : memref<4x512xf32, #tpu.memory_space<vmem>>, vector<4x256xf32>,
    %c0_40 = arith.constant 0 : index
    %c0_41 = arith.constant 0 : index
    %79 = vector.load %arg2[%c0_40, %c0_41] : memref<24x4xf32, #tpu.memory_space<vmem>>, vector<24x4xf32>
    %c0_42 = arith.constant 0 : index
    %c0_43 = arith.constant 0 : index
    %80 = vector.load %arg10[%c0_42, %c0_43] : memref<4x512xf32, #tpu.memory_space<vmem>>, vector<4x512xf32>
    %cst_44 = arith.constant dense<0.000000e+00> : vector<24x512xf32>
    %81 = tpu.matmul %79, %80, %cst_44 {dimension_numbers = #tpu.dot_dimension_numbers<[1], [0], [0], [1], [0, 0, 1, 1], [], []>} : vector<24x4xf32>, vector<4x512xf32>, vector<24x512xf32> -> vector<24x512xf32>
    %82 = vector.extract_strided_slice %81 {offsets = [0, 0], sizes = [16, 512], strides = [1, 1]} : vector<24x512xf32> to vector<16x512xf32>
    %c0_45 = arith.constant 0 : index
    %c0_46 = arith.constant 0 : index
    %83 = vector.load %arg3[%c0_45, %c0_46] : memref<16x1xf32, #tpu.memory_space<vmem>>, vector<16x1xf32>
    %84 = vector.broadcast %83 : vector<16x1xf32> to vector<16x512xf32>
    %85 = arith.addf %82, %84 : vector<16x512xf32>
    %cst_47 = arith.constant 0.000000e+00 : f32
    %86 = vector.broadcast %cst_47 : f32 to vector<16x512xf32>
    %87 = arith.maximumf %85, %86 : vector<16x512xf32>
    %88 = vector.extract_strided_slice %81 {offsets = [16, 0], sizes = [8, 512], strides = [1, 1]} : vector<24x512xf32> to vector<8x512xf32>
    %89 = vector.extract_strided_slice %87 {offsets = [0, 0], sizes = [16, 256], strides = [1, 1]} : vector<16x512xf32> to vector<16x256xf32>
    %c0_48 = arith.constant 0 : index
    %c128 = arith.constant 128 : index
    %90 = vector.load %arg11[%c0_48, %c128] : memref<16x896xf32, #tpu.memory_space<vmem>>, vector<16x256xf32>
    tpu.vector_store %arg11[%c0_48, %c128], %89 {strides = array<i32>} : memref<16x896xf32, #tpu.memory_space<vmem>>, vector<16x256xf32>,
    %91 = vector.extract_strided_slice %87 {offsets = [0, 256], sizes = [16, 256], strides = [1, 1]} : vector<16x512xf32> to vector<16x256xf32>
    %c0_49 = arith.constant 0 : index
    %c512 = arith.constant 512 : index
    %92 = vector.load %arg11[%c0_49, %c512] : memref<16x896xf32, #tpu.memory_space<vmem>>, vector<16x256xf32>
    tpu.vector_store %arg11[%c0_49, %c512], %91 {strides = array<i32>} : memref<16x896xf32, #tpu.memory_space<vmem>>, vector<16x256xf32>,
    %c0_50 = arith.constant 0 : index
    %c111 = arith.constant 111 : index
    %93 = vector.load %arg11[%c0_50, %c111] : memref<16x896xf32, #tpu.memory_space<vmem>>, vector<16x256xf32>
    %cst_51 = arith.constant 0.000000e+00 : f32
    %94 = vector.broadcast %cst_51 : f32 to vector<16x256xf32>
    %95 = arith.select %27, %93, %94 : vector<16x256xi1>, vector<16x256xf32>
    %c0_52 = arith.constant 0 : index
    %c0_53 = arith.constant 0 : index
    %96 = vector.load %arg12[%c0_52, %c0_53] : memref<144x512xf32, #tpu.memory_space<vmem>>, vector<16x256xf32>
    tpu.vector_store %arg12[%c0_52, %c0_53], %95 {strides = array<i32>} : memref<144x512xf32, #tpu.memory_space<vmem>>, vector<16x256xf32>,
    %c0_54 = arith.constant 0 : index
    %c495 = arith.constant 495 : index
    %97 = vector.load %arg11[%c0_54, %c495] : memref<16x896xf32, #tpu.memory_space<vmem>>, vector<16x256xf32>
    %cst_55 = arith.constant 0.000000e+00 : f32
    %98 = vector.broadcast %cst_55 : f32 to vector<16x256xf32>
    %99 = arith.select %27, %97, %98 : vector<16x256xi1>, vector<16x256xf32>
    %c0_56 = arith.constant 0 : index
    %c256_57 = arith.constant 256 : index
    %100 = vector.load %arg12[%c0_56, %c256_57] : memref<144x512xf32, #tpu.memory_space<vmem>>, vector<16x256xf32>
    tpu.vector_store %arg12[%c0_56, %c256_57], %99 {strides = array<i32>} : memref<144x512xf32, #tpu.memory_space<vmem>>, vector<16x256xf32>,
    %c0_58 = arith.constant 0 : index
    %c112 = arith.constant 112 : index
    %101 = vector.load %arg11[%c0_58, %c112] : memref<16x896xf32, #tpu.memory_space<vmem>>, vector<16x256xf32>
    %c16 = arith.constant 16 : index
    %c0_59 = arith.constant 0 : index
    %102 = vector.load %arg12[%c16, %c0_59] : memref<144x512xf32, #tpu.memory_space<vmem>>, vector<16x256xf32>
    tpu.vector_store %arg12[%c16, %c0_59], %101 {strides = array<i32>} : memref<144x512xf32, #tpu.memory_space<vmem>>, vector<16x256xf32>,
    %c0_60 = arith.constant 0 : index
    %c496 = arith.constant 496 : index
    %103 = vector.load %arg11[%c0_60, %c496] : memref<16x896xf32, #tpu.memory_space<vmem>>, vector<16x256xf32>
    %c16_61 = arith.constant 16 : index
    %c256_62 = arith.constant 256 : index
    %104 = vector.load %arg12[%c16_61, %c256_62] : memref<144x512xf32, #tpu.memory_space<vmem>>, vector<16x256xf32>
    tpu.vector_store %arg12[%c16_61, %c256_62], %103 {strides = array<i32>} : memref<144x512xf32, #tpu.memory_space<vmem>>, vector<16x256xf32>,
    %c0_63 = arith.constant 0 : index
    %c113 = arith.constant 113 : index
    %105 = vector.load %arg11[%c0_63, %c113] : memref<16x896xf32, #tpu.memory_space<vmem>>, vector<16x256xf32>
    %cst_64 = arith.constant 0.000000e+00 : f32
    %106 = vector.broadcast %cst_64 : f32 to vector<16x256xf32>
    %107 = arith.select %38, %105, %106 : vector<16x256xi1>, vector<16x256xf32>
    %c32 = arith.constant 32 : index
    %c0_65 = arith.constant 0 : index
    %108 = vector.load %arg12[%c32, %c0_65] : memref<144x512xf32, #tpu.memory_space<vmem>>, vector<16x256xf32>
    tpu.vector_store %arg12[%c32, %c0_65], %107 {strides = array<i32>} : memref<144x512xf32, #tpu.memory_space<vmem>>, vector<16x256xf32>,
    %c0_66 = arith.constant 0 : index
    %c497 = arith.constant 497 : index
    %109 = vector.load %arg11[%c0_66, %c497] : memref<16x896xf32, #tpu.memory_space<vmem>>, vector<16x256xf32>
    %cst_67 = arith.constant 0.000000e+00 : f32
    %110 = vector.broadcast %cst_67 : f32 to vector<16x256xf32>
    %111 = arith.select %38, %109, %110 : vector<16x256xi1>, vector<16x256xf32>
    %c32_68 = arith.constant 32 : index
    %c256_69 = arith.constant 256 : index
    %112 = vector.load %arg12[%c32_68, %c256_69] : memref<144x512xf32, #tpu.memory_space<vmem>>, vector<16x256xf32>
    tpu.vector_store %arg12[%c32_68, %c256_69], %111 {strides = array<i32>} : memref<144x512xf32, #tpu.memory_space<vmem>>, vector<16x256xf32>,
    %c0_70 = arith.constant 0 : index
    %c127 = arith.constant 127 : index
    %113 = vector.load %arg11[%c0_70, %c127] : memref<16x896xf32, #tpu.memory_space<vmem>>, vector<16x256xf32>
    %cst_71 = arith.constant 0.000000e+00 : f32
    %114 = vector.broadcast %cst_71 : f32 to vector<16x256xf32>
    %115 = arith.select %27, %113, %114 : vector<16x256xi1>, vector<16x256xf32>
    %c48 = arith.constant 48 : index
    %c0_72 = arith.constant 0 : index
    %116 = vector.load %arg12[%c48, %c0_72] : memref<144x512xf32, #tpu.memory_space<vmem>>, vector<16x256xf32>
    tpu.vector_store %arg12[%c48, %c0_72], %115 {strides = array<i32>} : memref<144x512xf32, #tpu.memory_space<vmem>>, vector<16x256xf32>,
    %c0_73 = arith.constant 0 : index
    %c511 = arith.constant 511 : index
    %117 = vector.load %arg11[%c0_73, %c511] : memref<16x896xf32, #tpu.memory_space<vmem>>, vector<16x256xf32>
    %cst_74 = arith.constant 0.000000e+00 : f32
    %118 = vector.broadcast %cst_74 : f32 to vector<16x256xf32>
    %119 = arith.select %27, %117, %118 : vector<16x256xi1>, vector<16x256xf32>
    %c48_75 = arith.constant 48 : index
    %c256_76 = arith.constant 256 : index
    %120 = vector.load %arg12[%c48_75, %c256_76] : memref<144x512xf32, #tpu.memory_space<vmem>>, vector<16x256xf32>
    tpu.vector_store %arg12[%c48_75, %c256_76], %119 {strides = array<i32>} : memref<144x512xf32, #tpu.memory_space<vmem>>, vector<16x256xf32>,
    %c0_77 = arith.constant 0 : index
    %c128_78 = arith.constant 128 : index
    %121 = vector.load %arg11[%c0_77, %c128_78] : memref<16x896xf32, #tpu.memory_space<vmem>>, vector<16x256xf32>
    %c64 = arith.constant 64 : index
    %c0_79 = arith.constant 0 : index
    %122 = vector.load %arg12[%c64, %c0_79] : memref<144x512xf32, #tpu.memory_space<vmem>>, vector<16x256xf32>
    tpu.vector_store %arg12[%c64, %c0_79], %121 {strides = array<i32>} : memref<144x512xf32, #tpu.memory_space<vmem>>, vector<16x256xf32>,
    %c0_80 = arith.constant 0 : index
    %c512_81 = arith.constant 512 : index
    %123 = vector.load %arg11[%c0_80, %c512_81] : memref<16x896xf32, #tpu.memory_space<vmem>>, vector<16x256xf32>
    %c64_82 = arith.constant 64 : index
    %c256_83 = arith.constant 256 : index
    %124 = vector.load %arg12[%c64_82, %c256_83] : memref<144x512xf32, #tpu.memory_space<vmem>>, vector<16x256xf32>
    tpu.vector_store %arg12[%c64_82, %c256_83], %123 {strides = array<i32>} : memref<144x512xf32, #tpu.memory_space<vmem>>, vector<16x256xf32>,
    %c0_84 = arith.constant 0 : index
    %c129 = arith.constant 129 : index
    %125 = vector.load %arg11[%c0_84, %c129] : memref<16x896xf32, #tpu.memory_space<vmem>>, vector<16x256xf32>
    %cst_85 = arith.constant 0.000000e+00 : f32
    %126 = vector.broadcast %cst_85 : f32 to vector<16x256xf32>
    %127 = arith.select %38, %125, %126 : vector<16x256xi1>, vector<16x256xf32>
    %c80 = arith.constant 80 : index
    %c0_86 = arith.constant 0 : index
    %128 = vector.load %arg12[%c80, %c0_86] : memref<144x512xf32, #tpu.memory_space<vmem>>, vector<16x256xf32>
    tpu.vector_store %arg12[%c80, %c0_86], %127 {strides = array<i32>} : memref<144x512xf32, #tpu.memory_space<vmem>>, vector<16x256xf32>,
    %c0_87 = arith.constant 0 : index
    %c513 = arith.constant 513 : index
    %129 = vector.load %arg11[%c0_87, %c513] : memref<16x896xf32, #tpu.memory_space<vmem>>, vector<16x256xf32>
    %cst_88 = arith.constant 0.000000e+00 : f32
    %130 = vector.broadcast %cst_88 : f32 to vector<16x256xf32>
    %131 = arith.select %38, %129, %130 : vector<16x256xi1>, vector<16x256xf32>
    %c80_89 = arith.constant 80 : index
    %c256_90 = arith.constant 256 : index
    %132 = vector.load %arg12[%c80_89, %c256_90] : memref<144x512xf32, #tpu.memory_space<vmem>>, vector<16x256xf32>
    tpu.vector_store %arg12[%c80_89, %c256_90], %131 {strides = array<i32>} : memref<144x512xf32, #tpu.memory_space<vmem>>, vector<16x256xf32>,
    %c0_91 = arith.constant 0 : index
    %c143 = arith.constant 143 : index
    %133 = vector.load %arg11[%c0_91, %c143] : memref<16x896xf32, #tpu.memory_space<vmem>>, vector<16x256xf32>
    %cst_92 = arith.constant 0.000000e+00 : f32
    %134 = vector.broadcast %cst_92 : f32 to vector<16x256xf32>
    %135 = arith.select %27, %133, %134 : vector<16x256xi1>, vector<16x256xf32>
    %c96 = arith.constant 96 : index
    %c0_93 = arith.constant 0 : index
    %136 = vector.load %arg12[%c96, %c0_93] : memref<144x512xf32, #tpu.memory_space<vmem>>, vector<16x256xf32>
    tpu.vector_store %arg12[%c96, %c0_93], %135 {strides = array<i32>} : memref<144x512xf32, #tpu.memory_space<vmem>>, vector<16x256xf32>,
    %c0_94 = arith.constant 0 : index
    %c527 = arith.constant 527 : index
    %137 = vector.load %arg11[%c0_94, %c527] : memref<16x896xf32, #tpu.memory_space<vmem>>, vector<16x256xf32>
    %cst_95 = arith.constant 0.000000e+00 : f32
    %138 = vector.broadcast %cst_95 : f32 to vector<16x256xf32>
    %139 = arith.select %27, %137, %138 : vector<16x256xi1>, vector<16x256xf32>
    %c96_96 = arith.constant 96 : index
    %c256_97 = arith.constant 256 : index
    %140 = vector.load %arg12[%c96_96, %c256_97] : memref<144x512xf32, #tpu.memory_space<vmem>>, vector<16x256xf32>
    tpu.vector_store %arg12[%c96_96, %c256_97], %139 {strides = array<i32>} : memref<144x512xf32, #tpu.memory_space<vmem>>, vector<16x256xf32>,
    %c0_98 = arith.constant 0 : index
    %c144 = arith.constant 144 : index
    %141 = vector.load %arg11[%c0_98, %c144] : memref<16x896xf32, #tpu.memory_space<vmem>>, vector<16x256xf32>
    %c112_99 = arith.constant 112 : index
    %c0_100 = arith.constant 0 : index
    %142 = vector.load %arg12[%c112_99, %c0_100] : memref<144x512xf32, #tpu.memory_space<vmem>>, vector<16x256xf32>
    tpu.vector_store %arg12[%c112_99, %c0_100], %141 {strides = array<i32>} : memref<144x512xf32, #tpu.memory_space<vmem>>, vector<16x256xf32>,
    %c0_101 = arith.constant 0 : index
    %c528 = arith.constant 528 : index
    %143 = vector.load %arg11[%c0_101, %c528] : memref<16x896xf32, #tpu.memory_space<vmem>>, vector<16x256xf32>
    %c112_102 = arith.constant 112 : index
    %c256_103 = arith.constant 256 : index
    %144 = vector.load %arg12[%c112_102, %c256_103] : memref<144x512xf32, #tpu.memory_space<vmem>>, vector<16x256xf32>
    tpu.vector_store %arg12[%c112_102, %c256_103], %143 {strides = array<i32>} : memref<144x512xf32, #tpu.memory_space<vmem>>, vector<16x256xf32>,
    %c0_104 = arith.constant 0 : index
    %c145 = arith.constant 145 : index
    %145 = vector.load %arg11[%c0_104, %c145] : memref<16x896xf32, #tpu.memory_space<vmem>>, vector<16x256xf32>
    %cst_105 = arith.constant 0.000000e+00 : f32
    %146 = vector.broadcast %cst_105 : f32 to vector<16x256xf32>
    %147 = arith.select %38, %145, %146 : vector<16x256xi1>, vector<16x256xf32>
    %c128_106 = arith.constant 128 : index
    %c0_107 = arith.constant 0 : index
    %148 = vector.load %arg12[%c128_106, %c0_107] : memref<144x512xf32, #tpu.memory_space<vmem>>, vector<16x256xf32>
    tpu.vector_store %arg12[%c128_106, %c0_107], %147 {strides = array<i32>} : memref<144x512xf32, #tpu.memory_space<vmem>>, vector<16x256xf32>,
    %c0_108 = arith.constant 0 : index
    %c529 = arith.constant 529 : index
    %149 = vector.load %arg11[%c0_108, %c529] : memref<16x896xf32, #tpu.memory_space<vmem>>, vector<16x256xf32>
    %cst_109 = arith.constant 0.000000e+00 : f32
    %150 = vector.broadcast %cst_109 : f32 to vector<16x256xf32>
    %151 = arith.select %38, %149, %150 : vector<16x256xi1>, vector<16x256xf32>
    %c128_110 = arith.constant 128 : index
    %c256_111 = arith.constant 256 : index
    %152 = vector.load %arg12[%c128_110, %c256_111] : memref<144x512xf32, #tpu.memory_space<vmem>>, vector<16x256xf32>
    tpu.vector_store %arg12[%c128_110, %c256_111], %151 {strides = array<i32>} : memref<144x512xf32, #tpu.memory_space<vmem>>, vector<16x256xf32>,
    %c0_112 = arith.constant 0 : index
    %c0_113 = arith.constant 0 : index
    %153 = vector.load %arg4[%c0_112, %c0_113] : memref<8x144xf32, #tpu.memory_space<vmem>>, vector<8x144xf32>
    %c0_114 = arith.constant 0 : index
    %c0_115 = arith.constant 0 : index
    %154 = vector.load %arg12[%c0_114, %c0_115] : memref<144x512xf32, #tpu.memory_space<vmem>>, vector<144x512xf32>
    %cst_116 = arith.constant dense<0.000000e+00> : vector<8x512xf32>
    %155 = tpu.matmul %153, %154, %cst_116 {dimension_numbers = #tpu.dot_dimension_numbers<[1], [0], [0], [1], [0, 0, 1, 1], [], []>} : vector<8x144xf32>, vector<144x512xf32>, vector<8x512xf32> -> vector<8x512xf32>
    %c0_117 = arith.constant 0 : index
    %c0_118 = arith.constant 0 : index
    %156 = vector.load %arg14[%c0_117, %c0_118] : memref<16x512xf32, #tpu.memory_space<vmem>>, vector<8x512xf32>
    tpu.vector_store %arg14[%c0_117, %c0_118], %155 {strides = array<i32>} : memref<16x512xf32, #tpu.memory_space<vmem>>, vector<8x512xf32>,
    %157 = vector.extract_strided_slice %155 {offsets = [0, 0], sizes = [8, 256], strides = [1, 1]} : vector<8x512xf32> to vector<8x256xf32>
    %c0_119 = arith.constant 0 : index
    %c128_120 = arith.constant 128 : index
    %158 = vector.load %arg13[%c0_119, %c128_120] : memref<8x896xf32, #tpu.memory_space<vmem>>, vector<8x256xf32>
    tpu.vector_store %arg13[%c0_119, %c128_120], %157 {strides = array<i32>} : memref<8x896xf32, #tpu.memory_space<vmem>>, vector<8x256xf32>,
    %159 = vector.extract_strided_slice %155 {offsets = [0, 256], sizes = [8, 256], strides = [1, 1]} : vector<8x512xf32> to vector<8x256xf32>
    %c0_121 = arith.constant 0 : index
    %c512_122 = arith.constant 512 : index
    %160 = vector.load %arg13[%c0_121, %c512_122] : memref<8x896xf32, #tpu.memory_space<vmem>>, vector<8x256xf32>
    tpu.vector_store %arg13[%c0_121, %c512_122], %159 {strides = array<i32>} : memref<8x896xf32, #tpu.memory_space<vmem>>, vector<8x256xf32>,
    %c0_123 = arith.constant 0 : index
    %c111_124 = arith.constant 111 : index
    %161 = vector.load %arg13[%c0_123, %c111_124] : memref<8x896xf32, #tpu.memory_space<vmem>>, vector<8x256xf32>
    %cst_125 = arith.constant 0.000000e+00 : f32
    %162 = vector.broadcast %cst_125 : f32 to vector<8x256xf32>
    %163 = arith.select %49, %161, %162 : vector<8x256xi1>, vector<8x256xf32>
    %c0_126 = arith.constant 0 : index
    %c0_127 = arith.constant 0 : index
    %c0_128 = arith.constant 0 : index
    %164 = vector.load %arg5[%c0_126, %c0_127, %c0_128] : memref<9x8x1xf32, #tpu.memory_space<vmem>>, vector<1x8x1xf32>
    %165 = vector.shape_cast %164 : vector<1x8x1xf32> to vector<8x1xf32>
    %166 = vector.broadcast %165 : vector<8x1xf32> to vector<8x256xf32>
    %167 = arith.mulf %163, %166 : vector<8x256xf32>
    %c0_129 = arith.constant 0 : index
    %c112_130 = arith.constant 112 : index
    %168 = vector.load %arg13[%c0_129, %c112_130] : memref<8x896xf32, #tpu.memory_space<vmem>>, vector<8x256xf32>
    %c1_131 = arith.constant 1 : index
    %c0_132 = arith.constant 0 : index
    %c0_133 = arith.constant 0 : index
    %169 = vector.load %arg5[%c1_131, %c0_132, %c0_133] : memref<9x8x1xf32, #tpu.memory_space<vmem>>, vector<1x8x1xf32>
    %170 = vector.shape_cast %169 : vector<1x8x1xf32> to vector<8x1xf32>
    %171 = vector.broadcast %170 : vector<8x1xf32> to vector<8x256xf32>
    %172 = arith.mulf %168, %171 : vector<8x256xf32>
    %173 = arith.addf %167, %172 : vector<8x256xf32>
    %c0_134 = arith.constant 0 : index
    %c113_135 = arith.constant 113 : index
    %174 = vector.load %arg13[%c0_134, %c113_135] : memref<8x896xf32, #tpu.memory_space<vmem>>, vector<8x256xf32>
    %cst_136 = arith.constant 0.000000e+00 : f32
    %175 = vector.broadcast %cst_136 : f32 to vector<8x256xf32>
    %176 = arith.select %60, %174, %175 : vector<8x256xi1>, vector<8x256xf32>
    %c2 = arith.constant 2 : index
    %c0_137 = arith.constant 0 : index
    %c0_138 = arith.constant 0 : index
    %177 = vector.load %arg5[%c2, %c0_137, %c0_138] : memref<9x8x1xf32, #tpu.memory_space<vmem>>, vector<1x8x1xf32>
    %178 = vector.shape_cast %177 : vector<1x8x1xf32> to vector<8x1xf32>
    %179 = vector.broadcast %178 : vector<8x1xf32> to vector<8x256xf32>
    %180 = arith.mulf %176, %179 : vector<8x256xf32>
    %181 = arith.addf %173, %180 : vector<8x256xf32>
    %c0_139 = arith.constant 0 : index
    %c127_140 = arith.constant 127 : index
    %182 = vector.load %arg13[%c0_139, %c127_140] : memref<8x896xf32, #tpu.memory_space<vmem>>, vector<8x256xf32>
    %cst_141 = arith.constant 0.000000e+00 : f32
    %183 = vector.broadcast %cst_141 : f32 to vector<8x256xf32>
    %184 = arith.select %49, %182, %183 : vector<8x256xi1>, vector<8x256xf32>
    %c3 = arith.constant 3 : index
    %c0_142 = arith.constant 0 : index
    %c0_143 = arith.constant 0 : index
    %185 = vector.load %arg5[%c3, %c0_142, %c0_143] : memref<9x8x1xf32, #tpu.memory_space<vmem>>, vector<1x8x1xf32>
    %186 = vector.shape_cast %185 : vector<1x8x1xf32> to vector<8x1xf32>
    %187 = vector.broadcast %186 : vector<8x1xf32> to vector<8x256xf32>
    %188 = arith.mulf %184, %187 : vector<8x256xf32>
    %189 = arith.addf %181, %188 : vector<8x256xf32>
    %c0_144 = arith.constant 0 : index
    %c128_145 = arith.constant 128 : index
    %190 = vector.load %arg13[%c0_144, %c128_145] : memref<8x896xf32, #tpu.memory_space<vmem>>, vector<8x256xf32>
    %c4 = arith.constant 4 : index
    %c0_146 = arith.constant 0 : index
    %c0_147 = arith.constant 0 : index
    %191 = vector.load %arg5[%c4, %c0_146, %c0_147] : memref<9x8x1xf32, #tpu.memory_space<vmem>>, vector<1x8x1xf32>
    %192 = vector.shape_cast %191 : vector<1x8x1xf32> to vector<8x1xf32>
    %193 = vector.broadcast %192 : vector<8x1xf32> to vector<8x256xf32>
    %194 = arith.mulf %190, %193 : vector<8x256xf32>
    %195 = arith.addf %189, %194 : vector<8x256xf32>
    %c0_148 = arith.constant 0 : index
    %c129_149 = arith.constant 129 : index
    %196 = vector.load %arg13[%c0_148, %c129_149] : memref<8x896xf32, #tpu.memory_space<vmem>>, vector<8x256xf32>
    %cst_150 = arith.constant 0.000000e+00 : f32
    %197 = vector.broadcast %cst_150 : f32 to vector<8x256xf32>
    %198 = arith.select %60, %196, %197 : vector<8x256xi1>, vector<8x256xf32>
    %c5 = arith.constant 5 : index
    %c0_151 = arith.constant 0 : index
    %c0_152 = arith.constant 0 : index
    %199 = vector.load %arg5[%c5, %c0_151, %c0_152] : memref<9x8x1xf32, #tpu.memory_space<vmem>>, vector<1x8x1xf32>
    %200 = vector.shape_cast %199 : vector<1x8x1xf32> to vector<8x1xf32>
    %201 = vector.broadcast %200 : vector<8x1xf32> to vector<8x256xf32>
    %202 = arith.mulf %198, %201 : vector<8x256xf32>
    %203 = arith.addf %195, %202 : vector<8x256xf32>
    %c0_153 = arith.constant 0 : index
    %c143_154 = arith.constant 143 : index
    %204 = vector.load %arg13[%c0_153, %c143_154] : memref<8x896xf32, #tpu.memory_space<vmem>>, vector<8x256xf32>
    %cst_155 = arith.constant 0.000000e+00 : f32
    %205 = vector.broadcast %cst_155 : f32 to vector<8x256xf32>
    %206 = arith.select %49, %204, %205 : vector<8x256xi1>, vector<8x256xf32>
    %c6 = arith.constant 6 : index
    %c0_156 = arith.constant 0 : index
    %c0_157 = arith.constant 0 : index
    %207 = vector.load %arg5[%c6, %c0_156, %c0_157] : memref<9x8x1xf32, #tpu.memory_space<vmem>>, vector<1x8x1xf32>
    %208 = vector.shape_cast %207 : vector<1x8x1xf32> to vector<8x1xf32>
    %209 = vector.broadcast %208 : vector<8x1xf32> to vector<8x256xf32>
    %210 = arith.mulf %206, %209 : vector<8x256xf32>
    %211 = arith.addf %203, %210 : vector<8x256xf32>
    %c0_158 = arith.constant 0 : index
    %c144_159 = arith.constant 144 : index
    %212 = vector.load %arg13[%c0_158, %c144_159] : memref<8x896xf32, #tpu.memory_space<vmem>>, vector<8x256xf32>
    %c7 = arith.constant 7 : index
    %c0_160 = arith.constant 0 : index
    %c0_161 = arith.constant 0 : index
    %213 = vector.load %arg5[%c7, %c0_160, %c0_161] : memref<9x8x1xf32, #tpu.memory_space<vmem>>, vector<1x8x1xf32>
    %214 = vector.shape_cast %213 : vector<1x8x1xf32> to vector<8x1xf32>
    %215 = vector.broadcast %214 : vector<8x1xf32> to vector<8x256xf32>
    %216 = arith.mulf %212, %215 : vector<8x256xf32>
    %217 = arith.addf %211, %216 : vector<8x256xf32>
    %c0_162 = arith.constant 0 : index
    %c145_163 = arith.constant 145 : index
    %218 = vector.load %arg13[%c0_162, %c145_163] : memref<8x896xf32, #tpu.memory_space<vmem>>, vector<8x256xf32>
    %cst_164 = arith.constant 0.000000e+00 : f32
    %219 = vector.broadcast %cst_164 : f32 to vector<8x256xf32>
    %220 = arith.select %60, %218, %219 : vector<8x256xi1>, vector<8x256xf32>
    %c8 = arith.constant 8 : index
    %c0_165 = arith.constant 0 : index
    %c0_166 = arith.constant 0 : index
    %221 = vector.load %arg5[%c8, %c0_165, %c0_166] : memref<9x8x1xf32, #tpu.memory_space<vmem>>, vector<1x8x1xf32>
    %222 = vector.shape_cast %221 : vector<1x8x1xf32> to vector<8x1xf32>
    %223 = vector.broadcast %222 : vector<8x1xf32> to vector<8x256xf32>
    %224 = arith.mulf %220, %223 : vector<8x256xf32>
    %225 = arith.addf %217, %224 : vector<8x256xf32>
    %c0_167 = arith.constant 0 : index
    %c0_168 = arith.constant 0 : index
    %226 = vector.load %arg6[%c0_167, %c0_168] : memref<8x1xf32, #tpu.memory_space<vmem>>, vector<8x1xf32>
    %227 = vector.broadcast %226 : vector<8x1xf32> to vector<8x256xf32>
    %228 = arith.addf %225, %227 : vector<8x256xf32>
    %cst_169 = arith.constant 0.000000e+00 : f32
    %229 = vector.broadcast %cst_169 : f32 to vector<8x256xf32>
    %230 = arith.maximumf %228, %229 : vector<8x256xf32>
    %c8_170 = arith.constant 8 : index
    %c0_171 = arith.constant 0 : index
    %231 = vector.load %arg14[%c8_170, %c0_171] : memref<16x512xf32, #tpu.memory_space<vmem>>, vector<8x256xf32>
    tpu.vector_store %arg14[%c8_170, %c0_171], %230 {strides = array<i32>} : memref<16x512xf32, #tpu.memory_space<vmem>>, vector<8x256xf32>,
    %c0_172 = arith.constant 0 : index
    %c495_173 = arith.constant 495 : index
    %232 = vector.load %arg13[%c0_172, %c495_173] : memref<8x896xf32, #tpu.memory_space<vmem>>, vector<8x256xf32>
    %cst_174 = arith.constant 0.000000e+00 : f32
    %233 = vector.broadcast %cst_174 : f32 to vector<8x256xf32>
    %234 = arith.select %49, %232, %233 : vector<8x256xi1>, vector<8x256xf32>
    %c0_175 = arith.constant 0 : index
    %c0_176 = arith.constant 0 : index
    %c0_177 = arith.constant 0 : index
    %235 = vector.load %arg5[%c0_175, %c0_176, %c0_177] : memref<9x8x1xf32, #tpu.memory_space<vmem>>, vector<1x8x1xf32>
    %236 = vector.shape_cast %235 : vector<1x8x1xf32> to vector<8x1xf32>
    %237 = vector.broadcast %236 : vector<8x1xf32> to vector<8x256xf32>
    %238 = arith.mulf %234, %237 : vector<8x256xf32>
    %c0_178 = arith.constant 0 : index
    %c496_179 = arith.constant 496 : index
    %239 = vector.load %arg13[%c0_178, %c496_179] : memref<8x896xf32, #tpu.memory_space<vmem>>, vector<8x256xf32>
    %c1_180 = arith.constant 1 : index
    %c0_181 = arith.constant 0 : index
    %c0_182 = arith.constant 0 : index
    %240 = vector.load %arg5[%c1_180, %c0_181, %c0_182] : memref<9x8x1xf32, #tpu.memory_space<vmem>>, vector<1x8x1xf32>
    %241 = vector.shape_cast %240 : vector<1x8x1xf32> to vector<8x1xf32>
    %242 = vector.broadcast %241 : vector<8x1xf32> to vector<8x256xf32>
    %243 = arith.mulf %239, %242 : vector<8x256xf32>
    %244 = arith.addf %238, %243 : vector<8x256xf32>
    %c0_183 = arith.constant 0 : index
    %c497_184 = arith.constant 497 : index
    %245 = vector.load %arg13[%c0_183, %c497_184] : memref<8x896xf32, #tpu.memory_space<vmem>>, vector<8x256xf32>
    %cst_185 = arith.constant 0.000000e+00 : f32
    %246 = vector.broadcast %cst_185 : f32 to vector<8x256xf32>
    %247 = arith.select %60, %245, %246 : vector<8x256xi1>, vector<8x256xf32>
    %c2_186 = arith.constant 2 : index
    %c0_187 = arith.constant 0 : index
    %c0_188 = arith.constant 0 : index
    %248 = vector.load %arg5[%c2_186, %c0_187, %c0_188] : memref<9x8x1xf32, #tpu.memory_space<vmem>>, vector<1x8x1xf32>
    %249 = vector.shape_cast %248 : vector<1x8x1xf32> to vector<8x1xf32>
    %250 = vector.broadcast %249 : vector<8x1xf32> to vector<8x256xf32>
    %251 = arith.mulf %247, %250 : vector<8x256xf32>
    %252 = arith.addf %244, %251 : vector<8x256xf32>
    %c0_189 = arith.constant 0 : index
    %c511_190 = arith.constant 511 : index
    %253 = vector.load %arg13[%c0_189, %c511_190] : memref<8x896xf32, #tpu.memory_space<vmem>>, vector<8x256xf32>
    %cst_191 = arith.constant 0.000000e+00 : f32
    %254 = vector.broadcast %cst_191 : f32 to vector<8x256xf32>
    %255 = arith.select %49, %253, %254 : vector<8x256xi1>, vector<8x256xf32>
    %c3_192 = arith.constant 3 : index
    %c0_193 = arith.constant 0 : index
    %c0_194 = arith.constant 0 : index
    %256 = vector.load %arg5[%c3_192, %c0_193, %c0_194] : memref<9x8x1xf32, #tpu.memory_space<vmem>>, vector<1x8x1xf32>
    %257 = vector.shape_cast %256 : vector<1x8x1xf32> to vector<8x1xf32>
    %258 = vector.broadcast %257 : vector<8x1xf32> to vector<8x256xf32>
    %259 = arith.mulf %255, %258 : vector<8x256xf32>
    %260 = arith.addf %252, %259 : vector<8x256xf32>
    %c0_195 = arith.constant 0 : index
    %c512_196 = arith.constant 512 : index
    %261 = vector.load %arg13[%c0_195, %c512_196] : memref<8x896xf32, #tpu.memory_space<vmem>>, vector<8x256xf32>
    %c4_197 = arith.constant 4 : index
    %c0_198 = arith.constant 0 : index
    %c0_199 = arith.constant 0 : index
    %262 = vector.load %arg5[%c4_197, %c0_198, %c0_199] : memref<9x8x1xf32, #tpu.memory_space<vmem>>, vector<1x8x1xf32>
    %263 = vector.shape_cast %262 : vector<1x8x1xf32> to vector<8x1xf32>
    %264 = vector.broadcast %263 : vector<8x1xf32> to vector<8x256xf32>
    %265 = arith.mulf %261, %264 : vector<8x256xf32>
    %266 = arith.addf %260, %265 : vector<8x256xf32>
    %c0_200 = arith.constant 0 : index
    %c513_201 = arith.constant 513 : index
    %267 = vector.load %arg13[%c0_200, %c513_201] : memref<8x896xf32, #tpu.memory_space<vmem>>, vector<8x256xf32>
    %cst_202 = arith.constant 0.000000e+00 : f32
    %268 = vector.broadcast %cst_202 : f32 to vector<8x256xf32>
    %269 = arith.select %60, %267, %268 : vector<8x256xi1>, vector<8x256xf32>
    %c5_203 = arith.constant 5 : index
    %c0_204 = arith.constant 0 : index
    %c0_205 = arith.constant 0 : index
    %270 = vector.load %arg5[%c5_203, %c0_204, %c0_205] : memref<9x8x1xf32, #tpu.memory_space<vmem>>, vector<1x8x1xf32>
    %271 = vector.shape_cast %270 : vector<1x8x1xf32> to vector<8x1xf32>
    %272 = vector.broadcast %271 : vector<8x1xf32> to vector<8x256xf32>
    %273 = arith.mulf %269, %272 : vector<8x256xf32>
    %274 = arith.addf %266, %273 : vector<8x256xf32>
    %c0_206 = arith.constant 0 : index
    %c527_207 = arith.constant 527 : index
    %275 = vector.load %arg13[%c0_206, %c527_207] : memref<8x896xf32, #tpu.memory_space<vmem>>, vector<8x256xf32>
    %cst_208 = arith.constant 0.000000e+00 : f32
    %276 = vector.broadcast %cst_208 : f32 to vector<8x256xf32>
    %277 = arith.select %49, %275, %276 : vector<8x256xi1>, vector<8x256xf32>
    %c6_209 = arith.constant 6 : index
    %c0_210 = arith.constant 0 : index
    %c0_211 = arith.constant 0 : index
    %278 = vector.load %arg5[%c6_209, %c0_210, %c0_211] : memref<9x8x1xf32, #tpu.memory_space<vmem>>, vector<1x8x1xf32>
    %279 = vector.shape_cast %278 : vector<1x8x1xf32> to vector<8x1xf32>
    %280 = vector.broadcast %279 : vector<8x1xf32> to vector<8x256xf32>
    %281 = arith.mulf %277, %280 : vector<8x256xf32>
    %282 = arith.addf %274, %281 : vector<8x256xf32>
    %c0_212 = arith.constant 0 : index
    %c528_213 = arith.constant 528 : index
    %283 = vector.load %arg13[%c0_212, %c528_213] : memref<8x896xf32, #tpu.memory_space<vmem>>, vector<8x256xf32>
    %c7_214 = arith.constant 7 : index
    %c0_215 = arith.constant 0 : index
    %c0_216 = arith.constant 0 : index
    %284 = vector.load %arg5[%c7_214, %c0_215, %c0_216] : memref<9x8x1xf32, #tpu.memory_space<vmem>>, vector<1x8x1xf32>
    %285 = vector.shape_cast %284 : vector<1x8x1xf32> to vector<8x1xf32>
    %286 = vector.broadcast %285 : vector<8x1xf32> to vector<8x256xf32>
    %287 = arith.mulf %283, %286 : vector<8x256xf32>
    %288 = arith.addf %282, %287 : vector<8x256xf32>
    %c0_217 = arith.constant 0 : index
    %c529_218 = arith.constant 529 : index
    %289 = vector.load %arg13[%c0_217, %c529_218] : memref<8x896xf32, #tpu.memory_space<vmem>>, vector<8x256xf32>
    %cst_219 = arith.constant 0.000000e+00 : f32
    %290 = vector.broadcast %cst_219 : f32 to vector<8x256xf32>
    %291 = arith.select %60, %289, %290 : vector<8x256xi1>, vector<8x256xf32>
    %c8_220 = arith.constant 8 : index
    %c0_221 = arith.constant 0 : index
    %c0_222 = arith.constant 0 : index
    %292 = vector.load %arg5[%c8_220, %c0_221, %c0_222] : memref<9x8x1xf32, #tpu.memory_space<vmem>>, vector<1x8x1xf32>
    %293 = vector.shape_cast %292 : vector<1x8x1xf32> to vector<8x1xf32>
    %294 = vector.broadcast %293 : vector<8x1xf32> to vector<8x256xf32>
    %295 = arith.mulf %291, %294 : vector<8x256xf32>
    %296 = arith.addf %288, %295 : vector<8x256xf32>
    %c0_223 = arith.constant 0 : index
    %c0_224 = arith.constant 0 : index
    %297 = vector.load %arg6[%c0_223, %c0_224] : memref<8x1xf32, #tpu.memory_space<vmem>>, vector<8x1xf32>
    %298 = vector.broadcast %297 : vector<8x1xf32> to vector<8x256xf32>
    %299 = arith.addf %296, %298 : vector<8x256xf32>
    %cst_225 = arith.constant 0.000000e+00 : f32
    %300 = vector.broadcast %cst_225 : f32 to vector<8x256xf32>
    %301 = arith.maximumf %299, %300 : vector<8x256xf32>
    %c8_226 = arith.constant 8 : index
    %c256_227 = arith.constant 256 : index
    %302 = vector.load %arg14[%c8_226, %c256_227] : memref<16x512xf32, #tpu.memory_space<vmem>>, vector<8x256xf32>
    tpu.vector_store %arg14[%c8_226, %c256_227], %301 {strides = array<i32>} : memref<16x512xf32, #tpu.memory_space<vmem>>, vector<8x256xf32>,
    %c0_228 = arith.constant 0 : index
    %c0_229 = arith.constant 0 : index
    %303 = vector.load %arg7[%c0_228, %c0_229] : memref<8x16xf32, #tpu.memory_space<vmem>>, vector<8x16xf32>
    %c0_230 = arith.constant 0 : index
    %c0_231 = arith.constant 0 : index
    %304 = vector.load %arg14[%c0_230, %c0_231] : memref<16x512xf32, #tpu.memory_space<vmem>>, vector<16x512xf32>
    %cst_232 = arith.constant dense<0.000000e+00> : vector<8x512xf32>
    %305 = tpu.matmul %303, %304, %cst_232 {dimension_numbers = #tpu.dot_dimension_numbers<[1], [0], [0], [1], [0, 0, 1, 1], [], []>} : vector<8x16xf32>, vector<16x512xf32>, vector<8x512xf32> -> vector<8x512xf32>
    %306 = arith.addf %305, %88 : vector<8x512xf32>
    %c0_233 = arith.constant 0 : index
    %c0_234 = arith.constant 0 : index
    %307 = vector.load %arg8[%c0_233, %c0_234] : memref<8x1xf32, #tpu.memory_space<vmem>>, vector<8x1xf32>
    %308 = vector.broadcast %307 : vector<8x1xf32> to vector<8x512xf32>
    %309 = arith.addf %306, %308 : vector<8x512xf32>
    %310 = vector.extract_strided_slice %309 {offsets = [0, 0], sizes = [8, 256], strides = [1, 1]} : vector<8x512xf32> to vector<8x256xf32>
    %c0_235 = arith.constant 0 : index
    %c0_236 = arith.constant 0 : index
    %c0_237 = arith.constant 0 : index
    %311 = vector.load %arg9[%c0_235, %c0_236, %c0_237] : memref<2x8x256xf32, #tpu.memory_space<vmem>>, vector<1x8x256xf32>
    %312 = vector.shape_cast %311 : vector<1x8x256xf32> to vector<8x256xf32>
    %313 = vector.shape_cast %310 : vector<8x256xf32> to vector<1x8x256xf32>
    tpu.vector_store %arg9[%c0_235, %c0_236, %c0_237], %313 {strides = array<i32>} : memref<2x8x256xf32, #tpu.memory_space<vmem>>, vector<1x8x256xf32>,
    %314 = vector.extract_strided_slice %309 {offsets = [0, 256], sizes = [8, 256], strides = [1, 1]} : vector<8x512xf32> to vector<8x256xf32>
    %c1_238 = arith.constant 1 : index
    %c0_239 = arith.constant 0 : index
    %c0_240 = arith.constant 0 : index
    %315 = vector.load %arg9[%c1_238, %c0_239, %c0_240] : memref<2x8x256xf32, #tpu.memory_space<vmem>>, vector<1x8x256xf32>
    %316 = vector.shape_cast %315 : vector<1x8x256xf32> to vector<8x256xf32>
    %317 = vector.shape_cast %314 : vector<8x256xf32> to vector<1x8x256xf32>
    tpu.vector_store %arg9[%c1_238, %c0_239, %c0_240], %317 {strides = array<i32>} : memref<2x8x256xf32, #tpu.memory_space<vmem>>, vector<1x8x256xf32>,
    return
  }
  func.func @transform_0(%arg0: i32) -> (i32, i32, i32) {
    %c0_i32 = arith.constant 0 : i32
    %c0_i32_0 = arith.constant 0 : i32
    %c0_i32_1 = arith.constant 0 : i32
    return %arg0, %c0_i32, %c0_i32_0 : i32, i32, i32
  }
  func.func @transform_1(%arg0: i32) -> (i32, i32) {
    %c0_i32 = arith.constant 0 : i32
    %c0_i32_0 = arith.constant 0 : i32
    %c0_i32_1 = arith.constant 0 : i32
    return %c0_i32, %c0_i32_0 : i32, i32
  }
  func.func @transform_2(%arg0: i32) -> (i32, i32) {
    %c0_i32 = arith.constant 0 : i32
    %c0_i32_0 = arith.constant 0 : i32
    %c0_i32_1 = arith.constant 0 : i32
    return %c0_i32, %c0_i32_0 : i32, i32
  }
  func.func @transform_3(%arg0: i32) -> (i32, i32) {
    %c0_i32 = arith.constant 0 : i32
    %c0_i32_0 = arith.constant 0 : i32
    %c0_i32_1 = arith.constant 0 : i32
    return %c0_i32, %c0_i32_0 : i32, i32
  }
  func.func @transform_4(%arg0: i32) -> (i32, i32, i32) {
    %c0_i32 = arith.constant 0 : i32
    %c0_i32_0 = arith.constant 0 : i32
    %c0_i32_1 = arith.constant 0 : i32
    %c0_i32_2 = arith.constant 0 : i32
    return %c0_i32, %c0_i32_0, %c0_i32_1 : i32, i32, i32
  }
  func.func @transform_5(%arg0: i32) -> (i32, i32) {
    %c0_i32 = arith.constant 0 : i32
    %c0_i32_0 = arith.constant 0 : i32
    %c0_i32_1 = arith.constant 0 : i32
    return %c0_i32, %c0_i32_0 : i32, i32
  }
  func.func @transform_6(%arg0: i32) -> (i32, i32) {
    %c0_i32 = arith.constant 0 : i32
    %c0_i32_0 = arith.constant 0 : i32
    %c0_i32_1 = arith.constant 0 : i32
    return %c0_i32, %c0_i32_0 : i32, i32
  }
  func.func @transform_7(%arg0: i32) -> (i32, i32) {
    %c0_i32 = arith.constant 0 : i32
    %c0_i32_0 = arith.constant 0 : i32
    %c0_i32_1 = arith.constant 0 : i32
    return %c0_i32, %c0_i32_0 : i32, i32
  }
  func.func @transform_8(%arg0: i32) -> (i32, i32, i32) {
    %c0_i32 = arith.constant 0 : i32
    %c0_i32_0 = arith.constant 0 : i32
    %c0_i32_1 = arith.constant 0 : i32
    return %arg0, %c0_i32, %c0_i32_0 : i32, i32, i32
  }
}

</mosaic_0001>

<bundles_post_ra>
// kernel: tpu_custom_call.1
= control target key start
LH: loop header
LB: loop body
LE: loop exit
PB: predicated region body
PF: predicated region fallthrough
CT: control target
= control target key end

     0   :  { %vm114_vm0 = vcmask 1043456   ;;  %v2314_v4 = vmov 0.0   ;;  %vm104_vm1 = vcmask 31744   ;;  %v2315_v6 = vmov 0   ;;  %s3156_s0 = inlined_call_operand.vmem [shape: f32[2,4,256], index: 0, kind: input, shape index: {}]   ;;  %s3157_s1 = inlined_call_operand.vmem [shape: f32[24,4], index: 1, kind: input, shape index: {}]   ;;  %s3158_s2 = inlined_call_operand.vmem [shape: f32[16,1], index: 2, kind: input, shape index: {}]   ;;  %s3159_s3 = inlined_call_operand.vmem [shape: f32[8,144], index: 3, kind: input, shape index: {}]   ;;  %s3160_s4 = inlined_call_operand.vmem [shape: f32[9,8,1], index: 4, kind: input, shape index: {}]   ;;  %s3161_s5 = inlined_call_operand.vmem [shape: f32[8,1], index: 5, kind: input, shape index: {}]   ;;  %s3162_s6 = inlined_call_operand.vmem [shape: f32[8,16], index: 6, kind: input, shape index: {}]   ;;  %s3163_s7 = inlined_call_operand.vmem [shape: f32[8,1], index: 7, kind: input, shape index: {}]   ;;  %s3164_s8 = inlined_call_operand.hbm [shape: f32[2,8,256], index: 8, kind: output, shape index: {}]  }
   0x1   :  { %v90_v0 = vld [vmem:[%s3156_s0] sm:$0xff]  ;;  %v1817_v1 = vld [vmem:[%s3156_s0 + $0x8] sm:$0xff]  ;;  %187 = vmatprep.mubr.f32.mxu0 %v2314_v4  ;;  %270 = vmatprep.mubr.f32.mxu1 %v2314_v4 }
   0x2   :  { %v102_v2 = vcombine.high %v90_v0, %v90_v0  ;;  %v103_v3 = vcombine.high %v1817_v1, %v1817_v1  ;;  %v95_v5 = vld [vmem:[%s3157_s1] sm:$0xff]  ;;  %2016 = vset.pattern.permute.xlu0 %v2315_v6  ;;  %2257 = vset.pattern.permute.xlu1 %v2315_v6 }
   0x3   :  { %13 = vsyncpa [#allocation8], 0  ;;  %v289_v7 = vld [vmem:[%s3158_s2] sm:$0xff]  ;;  %v96_v8 = vld [vmem:[%s3157_s1 + $0x8] sm:$0xff]  ;;  %s2316_s14 = smov 17   ;;  %s2317_s17 = smov 16  }
   0x4   :  { %1818 = vmatprep.subr.msk.mxu0 %vm114_vm0, %v102_v2  ;;  %1823 = vmatprep.subr.msk.mxu1 %vm114_vm0, %v103_v3  ;;  %v290_v9 = vld [vmem:[%s3158_s2 + $0x8] sm:$0xff]  ;;  %s2318_s18 = smov 15   ;;  %s2319_s2 = smov 1   ;;  %v97_v50 = vld [vmem:[%s3157_s1 + $0x10] sm:$0xff]  ;;  %vm430_vm2 = vcmask 130048   ;;  %v1836_v53 = vld [vmem:[%s3160_s4 + $0x38] sm:$0xff]  ;;  %v30_v3 = vlaneseq }
   0x5   :  { %1819 = vmatpush1.msk.msra.mxu0 %vm114_vm0, %v90_v0  ;;  %1824 = vmatpush1.msk.msra.mxu1 %vm114_vm0, %v1817_v1  ;;  %s2320_s19 = smov 127   ;;  %s2321_s20 = smov 113   ;;  %v974_v51 = vld [vmem:[%s3159_s3 + $0x8] sm:$0xff]  ;;  %v1218_v54 = vld [vmem:[%s3160_s4] sm:$0xff]  ;;  %v1831_v55 = vld [vmem:[%s3160_s4 + $0x10] sm:$0xff]  ;;  %vm349_vm3 = vcmask 138240  }
   0x6   :  { %1820 = vmatmul.mubr.msk.f32.vlgmr.msra.gmra.mrb[0].mxu0 %vm104_vm1, %v95_v5  ;;  %1825 = vmatmul.mubr.msk.f32.vlgmr.msra.gmra.mrb[0].mxu1 %vm104_vm1, %v95_v5  ;;  %s2322_s21 = smov 112   ;;  %s2323_s22 = smov 111   ;;  %v1830_v52 = vld [vmem:[%s3160_s4 + $0x8] sm:$0xff]  ;;  %v1832_v56 = vld [vmem:[%s3160_s4 + $0x18] sm:$0xff]  ;;  %v1841_v61 = vld [vmem:[%s3160_s4 + $0x20] sm:$0xff]  ;;  %vm503_vm8 = vcmask 121856  }
   0x7   :  { %193 = vmatprep.mubr.f32.mxu0 %v2314_v4  ;;  %276 = vmatprep.mubr.f32.mxu1 %v2314_v4  ;;  %v1834_v62 = vld [vmem:[%s3160_s4 + $0x28] sm:$0xff]  ;;  %vm584_vm13 = vcmask 7168   ;;  %vm681_vm14 = vcmask 1039360   ;;  %vm762_vm15 = vcmask 924672   ;;  %vm843_vm0 = vcmask 916480  }
   0x8   :  { %293 = vperm.xlu0 %2016, %v289_v7   ;;  %2023 = vrot.lane.b32.xlu1 %v2314_v4, %s2316_s14  ;;  %v2558_v7 = vand.u32 127, %v30_v3 }
   0xa   :  { %1821 = vmatmul.mubr.msk.f32.gmra.mrb[2].mxu0 %vm104_vm1, %v96_v8  ;;  %1826 = vmatmul.mubr.msk.f32.gmra.mrb[2].mxu1 %vm104_vm1, %v96_v8 }
   0xb   :  { %199 = vmatprep.mubr.f32.mxu0 %v2314_v4  ;;  %282 = vmatprep.mubr.f32.mxu1 %v2314_v4 }
   0xc   :  { %298 = vperm.xlu0 %2016, %v290_v9   ;;  %2033 = vrot.lane.b32.xlu1 %v2314_v4, %s2317_s17 }
   0xe   :  { %1822 = vmatmul.mubr.msk.f32.gmra.mrb[4].mxu0 %vm104_vm1, %v97_v50  ;;  %1827 = vmatmul.mubr.msk.f32.gmra.mrb[4].mxu1 %vm104_vm1, %v97_v50  ;;  %vm916_vm1 = vcmask 908288  }
   0xf   :  { %1828 = vmatprep.mubr.msk.f32.mxu0 %vm430_vm2, %v974_v51  ;;  %1829 = vmatprep.mubr.msk.f32.mxu1 %vm430_vm2, %v974_v51 }
  0x10   :  { %2018 = vrot.lane.b32.xlu0 %v2314_v4, %s2316_s14  ;;  %2043 = vrot.lane.b32.xlu1 %v2314_v4, %s2318_s18 }
  0x14   :  { %2028 = vrot.lane.b32.xlu0 %v2314_v4, %s2317_s17  ;;  %2053 = vrot.lane.b32.xlu1 %v2314_v4, %s2319_s2 }
  0x18   :  { %2038 = vrot.lane.b32.xlu0 %v2314_v4, %s2318_s18 }
  0x1c   :  { %2048 = vrot.lane.b32.xlu0 %v2314_v4, %s2319_s2 }
  0x7a   :  { %v2534_v57 = vpop.permute.xlu1 %2023 }
  0x7e   :  { %v2538_v59 = vpop.permute.xlu1 %2033 }
  0x82   :  { %v2548_v63 = vpop.permute.xlu1 %2043 }
  0x86   :  { %v2552_v1 = vpop.permute.xlu1 %2053 }
  0x87   :  { %v294_v10 = vpop.permute.xlu0 %293 }
  0x8b   :  { %v299_v21 = vpop.permute.xlu0 %298 }
  0x8f   :  { %v2019_v58 = vpop.permute.xlu0 %2018 }
  0x93   :  { %v2540_v60 = vpop.permute.xlu0 %2028 }
  0x97   :  { %v2550_v0 = vpop.permute.xlu0 %2038 }
  0x9b   :  { %v2554_v2 = vpop.permute.xlu0 %2048 }
  0xd9   :  { %v189_v11 = vpop.f32.mrb[0].mxu0  ;;  %v272_v12 = vpop.f32.mrb[0].mxu1 }
  0xda   :  { %v301_v13 = vadd.f32 %v294_v10, %v189_v11  ;;  %v303_v14 = vadd.f32 %v294_v10, %v272_v12  ;;  %v191_v15 = vpop.f32.mrb[1].mxu0  ;;  %v274_v16 = vpop.f32.mrb[1].mxu1 }
  0xdb   :  { %v302_v17 = vadd.f32 %v294_v10, %v191_v15  ;;  %v304_v18 = vadd.f32 %v294_v10, %v274_v16  ;;  %v2563_v10 = vadd.s32 128, %v2558_v7 }
  0xdc   :  { %v2419_v19 = vmax.f32 %v301_v13, 0.0  ;;  %v2421_v20 = vmax.f32 %v303_v14, 0.0  ;;  %v37_v14 = vand.u32 15, %v2558_v7 }
  0xdd   :  { %v2423_v22 = vmax.f32 %v302_v17, 0.0  ;;  %v2425_v23 = vmax.f32 %v304_v18, 0.0  ;;  %v195_v24 = vpop.f32.mrb[2].mxu0  ;;  %v278_v25 = vpop.f32.mrb[2].mxu1  ;;  %v44_v13 = vand.u32 15, %v2563_v10 }
  0xde   :  { %v305_v26 = vadd.f32 %v299_v21, %v195_v24  ;;  %v307_v27 = vadd.f32 %v299_v21, %v278_v25  ;;  %v197_v28 = vpop.f32.mrb[3].mxu0  ;;  %v280_v29 = vpop.f32.mrb[3].mxu1  ;;  %v2579_v18 = vadd.s32 4294967295, %v37_v14  ;;  %v2021_v25 = vunpack.i.h.bf16 %v2019_v58 }
  0xdf   :  { %v306_v30 = vadd.f32 %v299_v21, %v197_v28  ;;  %v308_v31 = vadd.f32 %v299_v21, %v280_v29  ;;  %v2062_v32 = vpack.i.bf16 %v2425_v23, %v2421_v20  ;;  %v2057_v33 = vpack.i.bf16 %v2423_v22, %v2419_v19 }
  0xe0   :  { %v2431_v34 = vmax.f32 %v305_v26, 0.0  ;;  %v2433_v35 = vmax.f32 %v307_v27, 0.0  ;;  %v2097_v46 = vpack.i.bf16 %v2314_v4, %v2423_v22  ;;  %v2102_v47 = vpack.i.bf16 %v2314_v4, %v2425_v23 }
  0xe1   :  { %v2435_v36 = vmax.f32 %v306_v30, 0.0  ;;  %v2437_v37 = vmax.f32 %v308_v31, 0.0  ;;  %2063 = vrot.lane.b32.xlu0 %v2062_v32, %s2316_s14  ;;  %2058 = vrot.lane.b32.xlu1 %v2057_v33, %s2316_s14  ;;  %v2575_v17 = vadd.s32 4294967295, %v44_v13  ;;  %v2020_v28 = vunpack.i.l.bf16 %v2019_v58 }
  0xe2   :  { %v2443_v38 = vpack.i.bf16 %v2433_v35, %v2421_v20  ;;  %v2137_v41 = vpack.i.bf16 %v2431_v34, %v2419_v19  ;;  %v1920_v43 = vpack.c.bf16 %v2431_v34, %v2419_v19  ;;  %v1968_v45 = vpack.c.bf16 %v2433_v35, %v2421_v20 }
  0xe3   :  { %v2172_v39 = vpack.i.bf16 %v2435_v36, %v2431_v34  ;;  %v2177_v40 = vpack.i.bf16 %v2437_v37, %v2433_v35  ;;  %v1918_v42 = vpack.c.bf16 %v2435_v36, %v2423_v22  ;;  %v1966_v44 = vpack.c.bf16 %v2437_v37, %v2425_v23 }
  0xe4   :  { %v2212_v48 = vpack.i.bf16 %v2314_v4, %v2435_v36  ;;  %v2217_v49 = vpack.i.bf16 %v2314_v4, %v2437_v37  ;;  %vm60_vm4 = vcmp.ge.s32.totalorder %v2575_v17, 0  ;;  %vm59_vm5 = vcmp.ge.s32.totalorder %v2579_v18, 0 }
  0xe5   :  { %2068 = vrot.lane.b32.xlu0 %v2057_v33, %s2317_s17  ;;  %2143 = vrot.lane.b32.xlu1 %v2443_v38, %s2320_s19  ;;  %vm2592_vm6 = vmpackc.low %vm60_vm4, %vm60_vm4 }
  0xe6   :  { %vm2602_vm7 = vmpackc.low %vm59_vm5, %vm59_vm5 }
  0xe9   :  { %2073 = vrot.lane.b32.xlu0 %v2062_v32, %s2317_s17  ;;  %2153 = vrot.lane.b32.xlu1 %v2443_v38, %s2321_s20 }
  0xed   :  { %2078 = vrot.lane.b32.xlu0 %v2057_v33, %s2318_s18  ;;  %2163 = vrot.lane.b32.xlu1 %v2443_v38, %s2322_s21 }
  0xf1   :  { %2083 = vrot.lane.b32.xlu0 %v2062_v32, %s2318_s18  ;;  %2173 = vrot.lane.b32.xlu1 %v2172_v39, %s2316_s14 }
  0xf5   :  { %2088 = vrot.lane.b32.xlu0 %v2057_v33, %s2319_s2  ;;  %2178 = vrot.lane.b32.xlu1 %v2177_v40, %s2316_s14 }
  0xf9   :  { %2093 = vrot.lane.b32.xlu0 %v2062_v32, %s2319_s2  ;;  %2183 = vrot.lane.b32.xlu1 %v2172_v39, %s2317_s17 }
  0xfd   :  { %2098 = vrot.lane.b32.xlu0 %v2097_v46, %s2320_s19  ;;  %2188 = vrot.lane.b32.xlu1 %v2177_v40, %s2317_s17 }
 0x101   :  { %2103 = vrot.lane.b32.xlu0 %v2102_v47, %s2320_s19  ;;  %2193 = vrot.lane.b32.xlu1 %v2172_v39, %s2318_s18 }
 0x105   :  { %2108 = vrot.lane.b32.xlu0 %v2097_v46, %s2321_s20  ;;  %2198 = vrot.lane.b32.xlu1 %v2177_v40, %s2318_s18 }
 0x109   :  { %2113 = vrot.lane.b32.xlu0 %v2102_v47, %s2321_s20  ;;  %2203 = vrot.lane.b32.xlu1 %v2172_v39, %s2319_s2 }
 0x10d   :  { %2118 = vrot.lane.b32.xlu0 %v2097_v46, %s2322_s21  ;;  %2208 = vrot.lane.b32.xlu1 %v2177_v40, %s2319_s2 }
 0x111   :  { %2123 = vrot.lane.b32.xlu0 %v2102_v47, %s2322_s21  ;;  %2213 = vrot.lane.b32.xlu1 %v2212_v48, %s2320_s19 }
 0x115   :  { %2128 = vrot.lane.b32.xlu0 %v2097_v46, %s2323_s22  ;;  %2218 = vrot.lane.b32.xlu1 %v2217_v49, %s2320_s19  ;;  %v2025_v46 = vunpack.i.l.bf16 %v2534_v57 }
 0x119   :  { %2133 = vrot.lane.b32.xlu0 %v2102_v47, %s2323_s22  ;;  %2223 = vrot.lane.b32.xlu1 %v2212_v48, %s2321_s20 }
 0x11d   :  { %2138 = vrot.lane.b32.xlu0 %v2137_v41, %s2320_s19  ;;  %2228 = vrot.lane.b32.xlu1 %v2217_v49, %s2321_s20 }
 0x121   :  { %2148 = vrot.lane.b32.xlu0 %v2137_v41, %s2321_s20  ;;  %2233 = vrot.lane.b32.xlu1 %v2212_v48, %s2322_s21 }
 0x125   :  { %2158 = vrot.lane.b32.xlu0 %v2137_v41, %s2322_s21  ;;  %2238 = vrot.lane.b32.xlu1 %v2217_v49, %s2322_s21 }
 0x129   :  { %2168 = vrot.lane.b32.xlu0 %v2137_v41, %s2323_s22  ;;  %2243 = vrot.lane.b32.xlu1 %v2212_v48, %s2323_s22 }
 0x12d   :  { %1230 = vperm.xlu0 %2016, %v1830_v52   ;;  %2248 = vrot.lane.b32.xlu1 %v2217_v49, %s2323_s22 }
 0x131   :  { %1364 = vperm.xlu0 %2016, %v1836_v53   ;;  %2253 = vrot.lane.b32.xlu1 %v2443_v38, %s2323_s22 }
 0x135   :  { %1221 = vperm.xlu0 %2016, %v1218_v54   ;;  %1449 = vperm.xlu1 %2257, %v1830_v52   ;;  %v2026_v52 = vunpack.i.h.bf16 %v2534_v57 }
 0x139   :  { %1267 = vperm.xlu0 %2016, %v1831_v55   ;;  %1577 = vperm.xlu1 %2257, %v1836_v53  }
 0x13d   :  { %1290 = vperm.xlu0 %2016, %v1832_v56   ;;  %1441 = vperm.xlu1 %2257, %v1218_v54  }
 0x141   :  { %2259 = vrot.lane.b32.xlu0 %v2314_v4, %s2316_s14  ;;  %1485 = vperm.xlu1 %2257, %v1831_v55  }
 0x145   :  { %1517 = vperm.xlu0 %2016, %v1841_v61   ;;  %1507 = vperm.xlu1 %2257, %v1832_v56  }
 0x149   :  { %1330 = vperm.xlu0 %2016, %v1834_v62   ;;  %1301 = vperm.xlu1 %2257, %v1841_v61  }
 0x14d   :  { %2264 = vrot.lane.b32.xlu1 %v2314_v4, %s2318_s18 }
 0x151   :  { %1545 = vperm.xlu1 %2257, %v1834_v62  }
 0x153   :  { %v2064_v5 = vpop.permute.xlu0 %2063  ;;  %v2059_v6 = vpop.permute.xlu1 %2058 }
 0x154   :  { %v2061_v21 = vunpack.i.h.bf16 %v2059_v6  ;;  %v2060_v24 = vunpack.i.l.bf16 %v2059_v6  ;;  %v2066_v31 = vunpack.i.h.bf16 %v2064_v5  ;;  %v2065_v32 = vunpack.i.l.bf16 %v2064_v5 }
 0x156   :  { %v350_v33 = vsel %vm349_vm3, %v2020_v28, %v2060_v24  ;;  %v351_v38 = vsel %vm349_vm3, %v2060_v24, %v2061_v21  ;;  %v390_v55 = vsel %vm349_vm3, %v2025_v46, %v2065_v32  ;;  %v391_v56 = vsel %vm349_vm3, %v2065_v32, %v2066_v31 }
 0x157   :  { %v2069_v8 = vpop.permute.xlu0 %2068  ;;  %v2560_v9 = vpop.permute.xlu1 %2143  ;;  %v2031_v21 = vunpack.i.h.bf16 %v2540_v60  ;;  %v2030_v24 = vunpack.i.l.bf16 %v2540_v60  ;;  %v2035_v32 = vunpack.i.l.bf16 %v2538_v59  ;;  %v2036_v46 = vunpack.i.h.bf16 %v2538_v59 }
 0x158   :  { %v2071_v58 = vunpack.i.h.bf16 %v2069_v8  ;;  %v2070_v61 = vunpack.i.l.bf16 %v2069_v8 }
 0x15a   :  { %v432_v31 = vsel %vm430_vm2, %v2070_v61, %v2071_v58 }
 0x15b   :  { %v2565_v11 = vpop.permute.xlu0 %2073  ;;  %v2567_v12 = vpop.permute.xlu1 %2153 }
 0x15c   :  { %v2076_v8 = vunpack.i.h.bf16 %v2565_v11  ;;  %v2075_v28 = vunpack.i.l.bf16 %v2565_v11  ;;  %v2156_v20 = vunpack.i.h.bf16 %v2567_v12  ;;  %v2155_v35 = vunpack.i.l.bf16 %v2567_v12 }
 0x15f   :  { %v2571_v15 = vpop.permute.xlu0 %2078  ;;  %v2573_v16 = vpop.permute.xlu1 %2163 }
 0x163   :  { %v2581_v26 = vpop.permute.xlu0 %2083  ;;  %v2174_v27 = vpop.permute.xlu1 %2173 }
 0x164   :  { %v2176_v29 = vunpack.i.h.bf16 %v2174_v27  ;;  %v2175_v30 = vunpack.i.l.bf16 %v2174_v27 }
 0x166   :  { %v352_v39 = vsel %vm349_vm3, %v2021_v25, %v2175_v30  ;;  %v353_v40 = vsel %vm349_vm3, %v2175_v30, %v2176_v29  ;;  %v431_v29 = vsel %vm430_vm2, %v2030_v24, %v2070_v61 }
 0x167   :  { %v1896_v47 = vpack.c.bf16 %v353_v40, %v351_v38  ;;  %v1899_v48 = vpack.c.bf16 %v352_v39, %v350_v33  ;;  %v2597_v49 = vpop.permute.xlu0 %2088  ;;  %v2179_v50 = vpop.permute.xlu1 %2178  ;;  %v2632_v40 = vadd.s32 1, %v44_v13  ;;  %v2080_v13 = vunpack.i.l.bf16 %v2571_v15 }
 0x168   :  { %v2181_v53 = vunpack.i.h.bf16 %v2179_v50  ;;  %v2180_v54 = vunpack.i.l.bf16 %v2179_v50  ;;  %v2637_v50 = vadd.s32 1, %v37_v14 }
 0x169   :  { %1898 = vmatprep.subr.msk.bf16.mxu0 %vm2592_vm6, %v1896_v47  ;;  %vm74_vm9 = vcmp.lt.s32.totalorder %v2632_v40, 16 }
 0x16a   :  { %v392_v62 = vsel %vm349_vm3, %v2026_v52, %v2180_v54  ;;  %v393_v3 = vsel %vm349_vm3, %v2180_v54, %v2181_v53  ;;  %1901 = vmatpush1.bf16.msk.msra.mxu0 %vm2602_vm7, %v1899_v48  ;;  %v2041_v52 = vunpack.i.h.bf16 %v2550_v0  ;;  %v467_v53 = vsel %vm430_vm2, %v2035_v32, %v2075_v28  ;;  %vm2660_vm11 = vmpackc.low %vm74_vm9, %vm74_vm9 }
 0x16b   :  { %v1944_v5 = vpack.c.bf16 %v393_v3, %v391_v56  ;;  %v1947_v57 = vpack.c.bf16 %v392_v62, %v390_v55  ;;  %v2615_v6 = vpop.permute.xlu0 %2093  ;;  %v2184_v10 = vpop.permute.xlu1 %2183  ;;  %v468_v54 = vsel %vm430_vm2, %v2075_v28, %v2076_v8  ;;  %v2081_v55 = vunpack.i.h.bf16 %v2571_v15 }
 0x16c   :  { %v2186_v25 = vunpack.i.h.bf16 %v2184_v10  ;;  %v2185_v27 = vunpack.i.l.bf16 %v2184_v10  ;;  %v2040_v62 = vunpack.i.l.bf16 %v2550_v0  ;;  %vm73_vm10 = vcmp.lt.s32.totalorder %v2637_v50, 16  ;;  %v1843_v0 = vld [vmem:[%s3160_s4 + $0x30] sm:$0xff] }
 0x16d   :  { %1946 = vmatprep.subr.msk.bf16.mxu1 %vm2592_vm6, %v1944_v5  ;;  %v2086_v15 = vunpack.i.h.bf16 %v2581_v26  ;;  %vm2670_vm12 = vmpackc.low %vm73_vm10, %vm73_vm10 }
 0x16e   :  { %v433_v30 = vsel %vm430_vm2, %v2031_v21, %v2185_v27  ;;  %1949 = vmatpush1.bf16.msk.msra.mxu1 %vm2602_vm7, %v1947_v57  ;;  %v434_v60 = vsel %vm430_vm2, %v2185_v27, %v2186_v25  ;;  %v2085_v57 = vunpack.i.l.bf16 %v2581_v26  ;;  %v504_v10 = vsel %vm503_vm8, %v2040_v62, %v2080_v13 }
 0x16f   :  { %v1904_v33 = vpack.c.bf16 %v433_v30, %v431_v29  ;;  %v2630_v38 = vpop.permute.xlu0 %2098  ;;  %v2189_v11 = vpop.permute.xlu1 %2188  ;;  %v1902_v39 = vpack.c.bf16 %v434_v60, %v432_v31  ;;  %v505_v21 = vsel %vm503_vm8, %v2080_v13, %v2081_v55  ;;  %v2045_v27 = vunpack.i.l.bf16 %v2548_v63  ;;  %v1620_v30 = vld [vmem:[%s3161_s5] sm:$0xff] }
 0x170   :  { %v2191_v47 = vunpack.i.h.bf16 %v2189_v11  ;;  %v2190_v48 = vunpack.i.l.bf16 %v2189_v11  ;;  %v2046_v31 = vunpack.i.h.bf16 %v2548_v63  ;;  %v545_v11 = vsel %vm503_vm8, %v2085_v57, %v2086_v15 }
 0x171   :  { %1903 = vmatprep.subr.bf16.mxu0 %v1902_v39  ;;  %v2091_v39 = vunpack.i.h.bf16 %v2597_v49  ;;  %v2051_v55 = vunpack.i.h.bf16 %v2554_v2  ;;  %v2050_v13 = vunpack.i.l.bf16 %v2554_v2  ;;  %v2055_v2 = vunpack.i.l.bf16 %v2552_v1 }
 0x172   :  { %v469_v56 = vsel %vm430_vm2, %v2036_v46, %v2190_v48  ;;  %1905 = vmatpush1.bf16.msra.mxu0 %v1904_v33  ;;  %v470_v59 = vsel %vm430_vm2, %v2190_v48, %v2191_v47  ;;  %v544_v33 = vsel %vm503_vm8, %v2045_v27, %v2085_v57  ;;  %v2090_v46 = vunpack.i.l.bf16 %v2597_v49 }
 0x173   :  { %v1952_v7 = vpack.c.bf16 %v469_v56, %v467_v53  ;;  %v2646_v14 = vpop.permute.xlu0 %2103  ;;  %v2194_v58 = vpop.permute.xlu1 %2193  ;;  %v1950_v61 = vpack.c.bf16 %v470_v59, %v468_v54  ;;  %v2096_v49 = vunpack.i.h.bf16 %v2615_v6 }
 0x174   :  { %v2196_v3 = vunpack.i.h.bf16 %v2194_v58  ;;  %v2195_v5 = vunpack.i.l.bf16 %v2194_v58  ;;  %v585_v58 = vsel %vm584_vm13, %v2050_v13, %v2090_v46 }
 0x175   :  { %1951 = vmatprep.subr.bf16.mxu1 %v1950_v61  ;;  %v586_v61 = vsel %vm584_vm13, %v2090_v46, %v2091_v39  ;;  %v2106_v46 = vunpack.i.h.bf16 %v2646_v14 }
 0x176   :  { %v506_v24 = vsel %vm503_vm8, %v2041_v52, %v2195_v5  ;;  %v507_v25 = vsel %vm503_vm8, %v2195_v5, %v2196_v3  ;;  %1953 = vmatpush1.bf16.msra.mxu1 %v1952_v7  ;;  %v2095_v7 = vunpack.i.l.bf16 %v2615_v6 }
 0x177   :  { %v1906_v26 = vpack.c.bf16 %v507_v25, %v505_v21  ;;  %v1909_v8 = vpack.c.bf16 %v506_v24, %v504_v10  ;;  %v2665_v28 = vpop.permute.xlu0 %2108  ;;  %v2199_v29 = vpop.permute.xlu1 %2198  ;;  %v2056_v10 = vunpack.i.h.bf16 %v2552_v1 }
 0x178   :  { %v2201_v60 = vunpack.i.h.bf16 %v2199_v29  ;;  %v2200_v32 = vunpack.i.l.bf16 %v2199_v29  ;;  %v625_v25 = vsel %vm584_vm13, %v2055_v2, %v2095_v7  ;;  %v626_v27 = vsel %vm584_vm13, %v2095_v7, %v2096_v49 }
 0x179   :  { %1908 = vmatprep.subr.msk.bf16.mxu0 %vm2660_vm11, %v1906_v26  ;;  %v2101_v26 = vunpack.i.h.bf16 %v2630_v38  ;;  %v2111_v23 = vunpack.i.h.bf16 %v2665_v28  ;;  %v2110_v37 = vunpack.i.l.bf16 %v2665_v28 }
 0x17a   :  { %v546_v47 = vsel %vm503_vm8, %v2046_v31, %v2200_v32  ;;  %v547_v48 = vsel %vm503_vm8, %v2200_v32, %v2201_v60  ;;  %1911 = vmatpush1.bf16.msk.msra.mxu0 %vm2670_vm12, %v1909_v8  ;;  %v2100_v8 = vunpack.i.l.bf16 %v2630_v38 }
 0x17b   :  { %v1954_v63 = vpack.c.bf16 %v547_v48, %v545_v11  ;;  %v1957_v52 = vpack.c.bf16 %v546_v47, %v544_v33  ;;  %v2685_v53 = vpop.permute.xlu0 %2113  ;;  %v2204_v54 = vpop.permute.xlu1 %2203  ;;  %v2105_v47 = vunpack.i.l.bf16 %v2646_v14  ;;  %v2145_v14 = vunpack.i.l.bf16 %v2560_v9 }
 0x17c   :  { %v2206_v56 = vunpack.i.h.bf16 %v2204_v54  ;;  %v2205_v59 = vunpack.i.l.bf16 %v2204_v54  ;;  %v683_v38 = vsel %vm681_vm14, %v2100_v8, %v2101_v26  ;;  %v2116_v7 = vunpack.i.h.bf16 %v2685_v53 }
 0x17d   :  { %1956 = vmatprep.subr.msk.bf16.mxu1 %vm2660_vm11, %v1954_v63  ;;  %v2146_v63 = vunpack.i.h.bf16 %v2560_v9  ;;  %v722_v19 = vsel %vm681_vm14, %v2145_v14, %v2105_v47  ;;  %v723_v34 = vsel %vm681_vm14, %v2105_v47, %v2106_v46 }
 0x17e   :  { %v587_v62 = vsel %vm584_vm13, %v2051_v55, %v2205_v59  ;;  %v588_v3 = vsel %vm584_vm13, %v2205_v59, %v2206_v56  ;;  %1959 = vmatpush1.bf16.msk.msra.mxu1 %vm2670_vm12, %v1957_v52 }
 0x17f   :  { %v1912_v5 = vpack.c.bf16 %v588_v3, %v586_v61  ;;  %v1915_v15 = vpack.c.bf16 %v587_v62, %v585_v58  ;;  %v2700_v57 = vpop.permute.xlu0 %2118  ;;  %v2209_v6 = vpop.permute.xlu1 %2208  ;;  %v2115_v58 = vunpack.i.l.bf16 %v2685_v53 }
 0x180   :  { %v2211_v21 = vunpack.i.h.bf16 %v2209_v6  ;;  %v2210_v24 = vunpack.i.l.bf16 %v2209_v6 }
 0x181   :  { %1914 = vmatprep.subr.msk.bf16.mxu0 %vm2592_vm6, %v1912_v5  ;;  %v804_v6 = vsel %vm762_vm15, %v2115_v58, %v2116_v7 }
 0x182   :  { %v627_v29 = vsel %vm584_vm13, %v2056_v10, %v2210_v24  ;;  %v628_v31 = vsel %vm584_vm13, %v2210_v24, %v2211_v21  ;;  %1917 = vmatpush1.bf16.msk.msra.mxu0 %vm2602_vm7, %v1915_v15  ;;  %v803_v15 = vsel %vm762_vm15, %v2155_v35, %v2115_v58  ;;  %v2121_v10 = vunpack.i.h.bf16 %v2700_v57 }
 0x183   :  { %v1960_v1 = vpack.c.bf16 %v628_v31, %v626_v27  ;;  %v1963_v60 = vpack.c.bf16 %v627_v29, %v625_v25  ;;  %v2713_v32 = vpop.permute.xlu0 %2123  ;;  %v2214_v33 = vpop.permute.xlu1 %2213  ;;  %1919 = vmatprep.subr.bf16.mxu0 %v1918_v42  ;;  %v2120_v21 = vunpack.i.l.bf16 %v2700_v57 }
 0x184   :  { %v2216_v11 = vunpack.i.h.bf16 %v2214_v33  ;;  %v2215_v39 = vunpack.i.l.bf16 %v2214_v33  ;;  %v2126_v57 = vunpack.i.h.bf16 %v2713_v32 }
 0x185   :  { %1962 = vmatprep.subr.msk.bf16.mxu1 %vm2592_vm6, %v1960_v1 }
 0x186   :  { %v685_v48 = vsel %vm681_vm14, %v2215_v39, %v2216_v11  ;;  %1921 = vmatpush1.bf16.msra.mxu0 %v1920_v43  ;;  %1965 = vmatpush1.bf16.msk.msra.mxu1 %vm2602_vm7, %v1963_v60 }
 0x187   :  { %v1922_v22 = vpack.c.bf16 %v685_v48, %v683_v38  ;;  %v2729_v36 = vpop.permute.xlu0 %2128  ;;  %v2219_v42 = vpop.permute.xlu1 %2218  ;;  %1967 = vmatprep.subr.bf16.mxu1 %v1966_v44 }
 0x188   :  { %v2221_v52 = vunpack.i.h.bf16 %v2219_v42  ;;  %v2220_v54 = vunpack.i.l.bf16 %v2219_v42  ;;  %v2166_v42 = vunpack.i.h.bf16 %v2573_v16 }
 0x189   :  { %1924 = vmatprep.subr.msk.bf16.mxu0 %vm2660_vm11, %v1922_v22 }
 0x18a   :  { %v724_v43 = vsel %vm681_vm14, %v2146_v63, %v2220_v54  ;;  %v725_v55 = vsel %vm681_vm14, %v2220_v54, %v2221_v52  ;;  %1969 = vmatpush1.bf16.msra.mxu1 %v1968_v45  ;;  %v764_v45 = vsel %vm762_vm15, %v2110_v37, %v2111_v23  ;;  %v2165_v63 = vunpack.i.l.bf16 %v2573_v16 }
 0x18b   :  { %v1970_v44 = vpack.c.bf16 %v725_v55, %v723_v34  ;;  %v1973_v9 = vpack.c.bf16 %v724_v43, %v722_v19  ;;  %v2747_v13 = vpop.permute.xlu0 %2133  ;;  %v2224_v56 = vpop.permute.xlu1 %2223 }
 0x18c   :  { %v2226_v59 = vunpack.i.h.bf16 %v2224_v56  ;;  %v2225_v49 = vunpack.i.l.bf16 %v2224_v56 }
 0x18d   :  { %1972 = vmatprep.subr.msk.bf16.mxu1 %vm2660_vm11, %v1970_v44  ;;  %v2130_v44 = vunpack.i.l.bf16 %v2729_v36 }
 0x18e   :  { %1975 = vmatpush1.bf16.msk.msra.mxu1 %vm2670_vm12, %v1973_v9  ;;  %v766_v28 = vsel %vm762_vm15, %v2225_v49, %v2226_v59 }
 0x18f   :  { %v2139_v61 = vpop.permute.xlu0 %2138  ;;  %v2229_v62 = vpop.permute.xlu1 %2228  ;;  %v1928_v26 = vpack.c.bf16 %v766_v28, %v764_v45 }
 0x190   :  { %v2141_v3 = vunpack.i.h.bf16 %v2139_v61  ;;  %v2140_v2 = vunpack.i.l.bf16 %v2139_v61  ;;  %v2231_v53 = vunpack.i.h.bf16 %v2229_v62  ;;  %v2230_v5 = vunpack.i.l.bf16 %v2229_v62 }
 0x192   :  { %v682_v12 = vsel %vm681_vm14, %v2140_v2, %v2100_v8  ;;  %v684_v24 = vsel %vm681_vm14, %v2141_v3, %v2215_v39  ;;  %v805_v25 = vsel %vm762_vm15, %v2156_v20, %v2230_v5  ;;  %v806_v27 = vsel %vm762_vm15, %v2230_v5, %v2231_v53 }
 0x193   :  { %v1925_v29 = vpack.c.bf16 %v684_v24, %v682_v12  ;;  %v1976_v31 = vpack.c.bf16 %v806_v27, %v804_v6  ;;  %v1979_v1 = vpack.c.bf16 %v805_v25, %v803_v15  ;;  %v2149_v60 = vpop.permute.xlu0 %2148  ;;  %v2234_v33 = vpop.permute.xlu1 %2233  ;;  %v2125_v8 = vunpack.i.l.bf16 %v2713_v32 }
 0x194   :  { %v2151_v11 = vunpack.i.h.bf16 %v2149_v60  ;;  %v2150_v38 = vunpack.i.l.bf16 %v2149_v60  ;;  %v2236_v46 = vunpack.i.h.bf16 %v2234_v33  ;;  %v2235_v47 = vunpack.i.l.bf16 %v2234_v33 }
 0x195   :  { %1927 = vmatpush1.bf16.msk.msra.mxu0 %vm2670_vm12, %v1925_v29  ;;  %1978 = vmatprep.subr.msk.bf16.mxu1 %vm2592_vm6, %v1976_v31  ;;  %v845_v39 = vsel %vm843_vm0, %v2120_v21, %v2121_v10  ;;  %v880_v41 = vsel %vm843_vm0, %v2165_v63, %v2125_v8  ;;  %v881_v9 = vsel %vm843_vm0, %v2125_v8, %v2126_v57  ;;  %v2136_v3 = vunpack.i.h.bf16 %v2747_v13  ;;  %v1837_v8 = vld [vmem:[%s3160_s4 + $0x40] sm:$0xff] }
 0x196   :  { %v763_v48 = vsel %vm762_vm15, %v2150_v38, %v2110_v37  ;;  %v765_v22 = vsel %vm762_vm15, %v2151_v11, %v2225_v49  ;;  %1930 = vmatprep.subr.msk.bf16.mxu0 %vm2592_vm6, %v1928_v26  ;;  %1981 = vmatpush1.bf16.msk.msra.mxu1 %vm2602_vm7, %v1979_v1  ;;  %v847_v32 = vsel %vm843_vm0, %v2235_v47, %v2236_v46  ;;  %v2131_v37 = vunpack.i.h.bf16 %v2729_v36 }
 0x197   :  { %v1931_v14 = vpack.c.bf16 %v765_v22, %v763_v48  ;;  %v2159_v52 = vpop.permute.xlu0 %2158  ;;  %v2239_v54 = vpop.permute.xlu1 %2238  ;;  %v1934_v19 = vpack.c.bf16 %v847_v32, %v845_v39  ;;  %v2135_v2 = vunpack.i.l.bf16 %v2747_v13  ;;  %v973_v13 = vld [vmem:[%s3159_s3] sm:$0xff] }
 0x198   :  { %v2161_v34 = vunpack.i.h.bf16 %v2159_v52  ;;  %v2160_v43 = vunpack.i.l.bf16 %v2159_v52  ;;  %v2241_v55 = vunpack.i.h.bf16 %v2239_v54  ;;  %v2240_v23 = vunpack.i.l.bf16 %v2239_v54 }
 0x199   :  { %1933 = vmatpush1.bf16.msk.msra.mxu0 %vm2602_vm7, %v1931_v14  ;;  %v918_v62 = vsel %vm916_vm1, %v2130_v44, %v2131_v37  ;;  %v958_v25 = vsel %vm916_vm1, %v2135_v2, %v2136_v3 }
 0x19a   :  { %v844_v16 = vsel %vm843_vm0, %v2160_v43, %v2120_v21  ;;  %v846_v56 = vsel %vm843_vm0, %v2161_v34, %v2235_v47  ;;  %v882_v59 = vsel %vm843_vm0, %v2166_v42, %v2240_v23  ;;  %1935 = vmatprep.subr.bf16.mxu0 %v1934_v19  ;;  %v883_v49 = vsel %vm843_vm0, %v2240_v23, %v2241_v55 }
 0x19b   :  { %v1936_v7 = vpack.c.bf16 %v846_v56, %v844_v16  ;;  %v1984_v58 = vpack.c.bf16 %v882_v59, %v880_v41  ;;  %v2169_v20 = vpop.permute.xlu0 %2168  ;;  %v2244_v35 = vpop.permute.xlu1 %2243  ;;  %v1982_v45 = vpack.c.bf16 %v883_v49, %v881_v9 }
 0x19c   :  { %v2171_v36 = vunpack.i.h.bf16 %v2169_v20  ;;  %v2170_v28 = vunpack.i.l.bf16 %v2169_v20  ;;  %v2246_v51 = vunpack.i.h.bf16 %v2244_v35  ;;  %v2245_v61 = vunpack.i.l.bf16 %v2244_v35 }
 0x19d   :  { %1937 = vmatpush1.bf16.msra.mxu0 %v1936_v7  ;;  %1983 = vmatprep.subr.bf16.mxu1 %v1982_v45  ;;  %v1786_v7 = vld [vmem:[%s3163_s7] sm:$0xff] }
 0x19e   :  { %v917_v53 = vsel %vm916_vm1, %v2170_v28, %v2130_v44  ;;  %v919_v5 = vsel %vm916_vm1, %v2171_v36, %v2245_v61  ;;  %v920_v15 = vsel %vm916_vm1, %v2245_v61, %v2246_v51  ;;  %1985 = vmatpush1.bf16.msra.mxu1 %v1984_v58 }
 0x19f   :  { %v1938_v6 = vpack.c.bf16 %v920_v15, %v918_v62  ;;  %v1941_v10 = vpack.c.bf16 %v919_v5, %v917_v53  ;;  %v2249_v21 = vpop.permute.xlu1 %2248 }
 0x1a0   :  { %v2251_v12 = vunpack.i.h.bf16 %v2249_v21  ;;  %v2250_v24 = vunpack.i.l.bf16 %v2249_v21 }
 0x1a1   :  { %1940 = vmatprep.subr.msk.bf16.mxu0 %vm2660_vm11, %v1938_v6 }
 0x1a2   :  { %v960_v27 = vsel %vm916_vm1, %v2250_v24, %v2251_v12  ;;  %1943 = vmatpush1.bf16.msk.msra.mxu0 %vm2670_vm12, %v1941_v10 }
 0x1a3   :  { %v1986_v26 = vpack.c.bf16 %v960_v27, %v958_v25  ;;  %v2254_v29 = vpop.permute.xlu1 %2253 }
 0x1a4   :  { %v2256_v31 = vunpack.i.h.bf16 %v2254_v29  ;;  %v2255_v1 = vunpack.i.l.bf16 %v2254_v29 }
 0x1a5   :  { %1115 = vmatmul.mubr.f32.vlgmr.msra.gmra.mrb[6].mxu0 %v973_v13  ;;  %1988 = vmatprep.subr.msk.bf16.mxu1 %vm2660_vm11, %v1986_v26 }
 0x1a6   :  { %v957_v60 = vsel %vm916_vm1, %v2255_v1, %v2135_v2  ;;  %v959_v33 = vsel %vm916_vm1, %v2256_v31, %v2250_v24  ;;  %1708 = vmatprep.mubr.f32.mxu0 %v2314_v4 }
 0x1a7   :  { %v1989_v11 = vpack.c.bf16 %v959_v33, %v957_v60 }
 0x1a9   :  { %1991 = vmatpush1.bf16.msk.msra.mxu1 %vm2670_vm12, %v1989_v11 }
 0x1ac   :  { %v1231_v38 = vpop.permute.xlu0 %1230  ;;  %1186 = vmatmul.mubr.f32.vlgmr.msra.gmra.mrb[6].mxu1 %v973_v13 }
 0x1ad   :  { %v1233_v46 = vmul.f32 0.0, %v1231_v38  ;;  %1779 = vmatprep.mubr.f32.mxu1 %v2314_v4 }
 0x1af   :  { %1239 = vrot.lane.b32.xlu0 %v1233_v46, %s2317_s17 }
 0x1b0   :  { %v1365_v42 = vpop.permute.xlu0 %1364 }
 0x1b1   :  { %v1369_v43 = vmul.f32 0.0, %v1365_v42 }
 0x1b3   :  { %2269 = vrot.lane.b32.xlu0 %v2314_v4, %s2319_s2 }
 0x1b4   :  { %v1450_v47 = vpop.permute.xlu1 %1449  ;;  %v2895_v34 = vpop.permute.xlu0 %1221 }
 0x1b5   :  { %v1452_v57 = vmul.f32 0.0, %v1450_v47 }
 0x1b7   :  { %1567 = vperm.xlu0 %2016, %v1843_v0   ;;  %1458 = vrot.lane.b32.xlu1 %v1452_v57, %s2317_s17 }
 0x1b8   :  { %v2904_v23 = vpop.permute.xlu0 %1267 }
 0x1bb   :  { %2274 = vrot.lane.b32.xlu0 %v2314_v4, %s2320_s19  ;;  %1353 = vperm.xlu1 %2257, %v1843_v0  }
 0x1bc   :  { %v2913_v16 = vpop.permute.xlu0 %1290 }
 0x1bf   :  { %1623 = vperm.xlu0 %2016, %v1620_v30   ;;  %1401 = vperm.xlu1 %2257, %v1837_v8  }
 0x1c0   :  { %v2260_v58 = vpop.permute.xlu0 %2259 }
 0x1c3   :  { %1613 = vperm.xlu1 %2257, %v1837_v8   ;;  %2284 = vrot.lane.b32.xlu0 %v2314_v4, %s2323_s22 }
 0x1c4   :  { %v2926_v35 = vpop.permute.xlu0 %1517 }
 0x1c7   :  { %2279 = vrot.lane.b32.xlu1 %v2314_v4, %s2321_s20  ;;  %v1578_v4 = vpop.permute.xlu1 %1577 }
 0x1c8   :  { %v1582_v41 = vmul.f32 0.0, %v1578_v4  ;;  %v2930_v36 = vpop.permute.xlu0 %1330 }
 0x1cb   :  { %1411 = vperm.xlu1 %2257, %v1620_v30   ;;  %v2889_v52 = vpop.permute.xlu1 %1441 }
 0x1cf   :  { %v2899_v55 = vpop.permute.xlu1 %1485 }
 0x1d3   :  { %v2906_v37 = vpop.permute.xlu1 %1507 }
 0x1d7   :  { %v2917_v56 = vpop.permute.xlu1 %1301 }
 0x1db   :  { %v2265_v20 = vpop.permute.xlu1 %2264 }
 0x1dc   :  { %v2266_v8 = vunpack.i.l.bf16 %v2265_v20 }
 0x1df   :  { %v2928_v45 = vpop.permute.xlu1 %1545 }
 0x221   :  { %v2934_v51 = vpop.permute.xlu0 %1239 }
 0x225   :  { %v2270_v61 = vpop.permute.xlu0 %2269 }
 0x229   :  { %v2932_v28 = vpop.permute.xlu1 %1458 }
 0x236   :  { %v2938_v3 = vpop.permute.xlu0 %1567 }
 0x23a   :  { %v2936_v62 = vpop.permute.xlu1 %1353  ;;  %v2942_v53 = vpop.permute.xlu0 %2274 }
 0x23e   :  { %v2940_v2 = vpop.permute.xlu1 %1401  ;;  %v2946_v15 = vpop.permute.xlu0 %1623 }
 0x242   :  { %v2944_v5 = vpop.permute.xlu1 %1613  ;;  %v2950_v10 = vpop.permute.xlu0 %2284 }
 0x246   :  { %v2948_v6 = vpop.permute.xlu1 %2279 }
 0x24a   :  { %v2952_v21 = vpop.permute.xlu1 %1411 }
 0x278   :  { %v2835_v39 = vpop.f32.mrb[6].mxu0 }
 0x279   :  { %3176 = vst [vmem:[#allocation10_spill] sm:$0xff] %v2835_v39  ;;  %1253 = vrot.lane.b32.xlu1 %v2835_v39, %s2318_s18  ;;  %1208 = vrot.lane.b32.xlu0 %v2835_v39, %s2316_s14  ;;  %v2841_v48 = vpop.f32.mrb[7].mxu0  ;;  %v1234_v63 = vmul.f32 %v1231_v38, %v2835_v39  ;;  %v1367_v49 = vmul.f32 %v1365_v42, %v2835_v39 }
 0x27a   :  { %3177 = vst [vmem:[#allocation11_spill] sm:$0xff] %v2841_v48  ;;  %v1235_v14 = vmul.f32 %v1231_v38, %v2841_v48  ;;  %v1368_v9 = vmul.f32 %v1365_v42, %v2841_v48  ;;  %v2261_v42 = vunpack.i.l.bf16 %v2260_v58 }
 0x27f   :  { %v2843_v22 = vpop.f32.mrb[6].mxu1 }
 0x280   :  { %3178 = vst [vmem:[#allocation12_spill] sm:$0xff] %v2843_v22  ;;  %v2845_v32 = vpop.f32.mrb[7].mxu1  ;;  %1472 = vrot.lane.b32.xlu1 %v2843_v22, %s2318_s18  ;;  %1428 = vrot.lane.b32.xlu0 %v2843_v22, %s2316_s14  ;;  %v1453_v54 = vmul.f32 %v1450_v47, %v2843_v22  ;;  %v1580_v59 = vmul.f32 %v1578_v4, %v2843_v22 }
 0x281   :  { %v1454_v19 = vmul.f32 %v1450_v47, %v2845_v32  ;;  %v1581_v44 = vmul.f32 %v1578_v4, %v2845_v32  ;;  %v2262_v4 = vunpack.i.h.bf16 %v2260_v58 }
 0x284   :  { %1276 = vrot.lane.b32.xlu1 %v2835_v39, %s2319_s2  ;;  %1494 = vrot.lane.b32.xlu0 %v2843_v22, %s2319_s2 }
 0x288   :  { %1337 = vrot.lane.b32.xlu1 %v2835_v39, %s2321_s20  ;;  %1314 = vrot.lane.b32.xlu0 %v2835_v39, %s2320_s19 }
 0x28c   :  { %1530 = vrot.lane.b32.xlu0 %v2843_v22, %s2320_s19  ;;  %1210 = vrot.lane.b32.xlu1 %v2841_v48, %s2316_s14 }
 0x290   :  { %1552 = vrot.lane.b32.xlu0 %v2843_v22, %s2321_s20  ;;  %1430 = vrot.lane.b32.xlu1 %v2845_v32, %s2316_s14 }
 0x294   :  { %1255 = vrot.lane.b32.xlu0 %v2841_v48, %s2318_s18  ;;  %1496 = vrot.lane.b32.xlu1 %v2845_v32, %s2319_s2 }
 0x298   :  { %1474 = vrot.lane.b32.xlu0 %v2845_v32, %s2318_s18  ;;  %1316 = vrot.lane.b32.xlu1 %v2841_v48, %s2320_s19  ;;  %s2324_s18 = smov [#allocation7]  }
 0x29c   :  { %1278 = vrot.lane.b32.xlu0 %v2841_v48, %s2319_s2  ;;  %1532 = vrot.lane.b32.xlu1 %v2845_v32, %s2320_s19  ;;  %s1806_s2 = sshll.u32 %s2324_s18, 4  ;;  %s1807_s2 = int_to_ptr.vmem [resolvable:$true] %s1806_s2 }
 0x29d   :  { %p2295_p1 = scmp.lt.s32.totalorder %s1807_s2, %s1807_s2 }
 0x2a0   :  { %1339 = vrot.lane.b32.xlu0 %v2841_v48, %s2321_s20  ;;  %1387 = vrot.lane.b32.xlu1 %v2841_v48, %s2323_s22 }
 0x2a4   :  { %1554 = vrot.lane.b32.xlu0 %v2845_v32, %s2321_s20  ;;  %1600 = vrot.lane.b32.xlu1 %v2845_v32, %s2323_s22 }
 0x2a8   :  { %1241 = vrot.lane.b32.xlu1 %v1234_v63, %s2317_s17  ;;  %1243 = vrot.lane.b32.xlu0 %v1235_v14, %s2317_s17  ;;  %v2272_v63 = vunpack.i.h.bf16 %v2270_v61  ;;  %v2267_v14 = vunpack.i.h.bf16 %v2265_v20 }
 0x2ac   :  { %1460 = vrot.lane.b32.xlu1 %v1453_v54, %s2317_s17  ;;  %1462 = vrot.lane.b32.xlu0 %v1454_v19, %s2317_s17  ;;  %v2271_v54 = vunpack.i.l.bf16 %v2270_v61  ;;  %v2277_v19 = vunpack.i.h.bf16 %v2942_v53 }
 0x2b0   :  { %1377 = vrot.lane.b32.xlu1 %v1369_v43, %s2322_s21  ;;  %1385 = vrot.lane.b32.xlu0 %v2835_v39, %s2323_s22  ;;  %v2276_v43 = vunpack.i.l.bf16 %v2942_v53 }
 0x2b4   :  { %1598 = vrot.lane.b32.xlu1 %v2843_v22, %s2323_s22  ;;  %1590 = vrot.lane.b32.xlu0 %v1582_v41, %s2322_s21 }
 0x2b8   :  { %1588 = vrot.lane.b32.xlu1 %v1581_v44, %s2322_s21  ;;  %1375 = vrot.lane.b32.xlu0 %v1368_v9, %s2322_s21 }
 0x2bc   :  { %1586 = vrot.lane.b32.xlu1 %v1580_v59, %s2322_s21  ;;  %1373 = vrot.lane.b32.xlu0 %v1367_v49, %s2322_s21 }
 0x2c0   :  { %1789 = vperm.xlu0 %2016, %v1786_v7  }
 0x2eb   :  { %v1254_v12 = vpop.permute.xlu1 %1253  ;;  %v1209_v24 = vpop.permute.xlu0 %1208 }
 0x2ec   :  { %v1257_v41 = vsel %vm503_vm8, %v2266_v8, %v1254_v12  ;;  %v1212_v59 = vsel %vm349_vm3, %v2261_v42, %v1209_v24  ;;  %v2986_v42 = vmul.f32 %v2917_v56, %v2841_v48 }
 0x2ed   :  { %v1261_v44 = vsel %vm73_vm10, %v1257_v41, 0.0  ;;  %v1216_v20 = vsel %vm59_vm5, %v1212_v59, 0.0  ;;  %v2999_v41 = vmul.f32 %v2926_v35, %v2843_v22 }
 0x2f2   :  { %v1473_v25 = vpop.permute.xlu1 %1472  ;;  %v1429_v27 = vpop.permute.xlu0 %1428 }
 0x2f3   :  { %v1476_v49 = vsel %vm503_vm8, %v2267_v14, %v1473_v25  ;;  %v1432_v53 = vsel %vm349_vm3, %v2262_v4, %v1429_v27  ;;  %v2990_v14 = vmul.f32 %v2917_v56, %v2835_v39 }
 0x2f4   :  { %v1480_v4 = vsel %vm73_vm10, %v1476_v49, 0.0  ;;  %v3012_v49 = vmul.f32 %v2926_v35, %v2845_v32 }
 0x2f6   :  { %v1277_v13 = vpop.permute.xlu1 %1276  ;;  %v1495_v26 = vpop.permute.xlu0 %1494 }
 0x2f7   :  { %v1280_v8 = vsel %vm584_vm13, %v2271_v54, %v1277_v13  ;;  %v1498_v54 = vsel %vm584_vm13, %v2272_v63, %v1495_v26  ;;  %v1270_v63 = vmul.f32 %v2904_v23, %v1261_v44 }
 0x2fa   :  { %v2954_v29 = vpop.permute.xlu1 %1337  ;;  %v2956_v31 = vpop.permute.xlu0 %1314 }
 0x2fe   :  { %v2958_v1 = vpop.permute.xlu0 %1530  ;;  %v1211_v60 = vpop.permute.xlu1 %1210 }
 0x2ff   :  { %v1213_v9 = vsel %vm349_vm3, %v1209_v24, %v1211_v60  ;;  %v1436_v24 = vsel %vm59_vm5, %v1432_v53, 0.0  ;;  %v1284_v60 = vsel %vm59_vm5, %v1280_v8, 0.0  ;;  %v1224_v8 = vmul.f32 %v2895_v34, %v1216_v20 }
 0x300   :  { %v1217_v22 = vsel %vm60_vm4, %v1213_v9, 0.0  ;;  %v1444_v35 = vmul.f32 %v2889_v52, %v1436_v24  ;;  %v1293_v44 = vmul.f32 %v2913_v16, %v1284_v60 }
 0x302   :  { %v2960_v33 = vpop.permute.xlu0 %1552  ;;  %v1431_v11 = vpop.permute.xlu1 %1430 }
 0x303   :  { %v1433_v53 = vsel %vm349_vm3, %v1429_v27, %v1431_v11 }
 0x304   :  { %v1437_v11 = vsel %vm60_vm4, %v1433_v53, 0.0 }
 0x306   :  { %v1256_v38 = vpop.permute.xlu0 %1255  ;;  %v1497_v46 = vpop.permute.xlu1 %1496 }
 0x307   :  { %v1258_v56 = vsel %vm503_vm8, %v1254_v12, %v1256_v38  ;;  %v1499_v39 = vsel %vm584_vm13, %v1495_v26, %v1497_v46  ;;  %v1488_v12 = vmul.f32 %v2899_v55, %v1480_v4  ;;  %v1502_v38 = vsel %vm59_vm5, %v1498_v54, 0.0 }
 0x308   :  { %v1262_v9 = vsel %vm74_vm9, %v1258_v56, 0.0  ;;  %v1225_v26 = vmul.f32 %v2895_v34, %v1217_v22  ;;  %v1503_v46 = vsel %vm60_vm4, %v1499_v39, 0.0  ;;  %v1510_v4 = vmul.f32 %v2906_v37, %v1502_v38 }
 0x309   :  { %v1271_v34 = vmul.f32 %v2904_v23, %v1262_v9  ;;  %v1511_v60 = vmul.f32 %v2906_v37, %v1503_v46 }
 0x30a   :  { %v1475_v0 = vpop.permute.xlu0 %1474  ;;  %v2962_v47 = vpop.permute.xlu1 %1316 }
 0x30b   :  { %v1477_v27 = vsel %vm503_vm8, %v1473_v25, %v1475_v0 }
 0x30c   :  { %v1481_v39 = vsel %vm74_vm9, %v1477_v27, 0.0 }
 0x30e   :  { %v1279_v57 = vpop.permute.xlu0 %1278  ;;  %v2964_v30 = vpop.permute.xlu1 %1532 }
 0x30f   :  { %v1281_v48 = vsel %vm584_vm13, %v1277_v13, %v1279_v57  ;;  %v1321_v13 = vsel %vm681_vm14, %v2962_v47, %v2276_v43  ;;  %v1445_v43 = vmul.f32 %v2889_v52, %v1437_v11  ;;  %v1537_v23 = vsel %vm681_vm14, %v2964_v30, %v2277_v19 }
 0x310   :  { %v1285_v54 = vsel %vm60_vm4, %v1281_v48, 0.0  ;;  %v1320_v48 = vsel %vm681_vm14, %v2956_v31, %v2962_v47  ;;  %v1489_v52 = vmul.f32 %v2899_v55, %v1481_v39  ;;  %v1536_v37 = vsel %vm681_vm14, %v2958_v1, %v2964_v30 }
 0x311   :  { %v1294_v56 = vmul.f32 %v2913_v16, %v1285_v54  ;;  %v1541_v19 = vsel %vm74_vm9, %v1537_v23, 0.0 }
 0x312   :  { %v2973_v7 = vpop.permute.xlu0 %1339  ;;  %v2975_v58 = vpop.permute.xlu1 %1387 }
 0x313   :  { %v1343_v55 = vsel %vm762_vm15, %v2954_v29, %v2973_v7  ;;  %v1324_v29 = vsel %vm73_vm10, %v1320_v48, 0.0 }
 0x316   :  { %v3006_v61 = vpop.permute.xlu0 %1554  ;;  %v3008_v59 = vpop.permute.xlu1 %1600 }
 0x317   :  { %v1558_v39 = vsel %vm762_vm15, %v2960_v33, %v3006_v61  ;;  %v1333_v33 = vmul.f32 %v2930_v36, %v1324_v29 }
 0x31a   :  { %v1242_v57 = vpop.permute.xlu1 %1241  ;;  %v1244_v20 = vpop.permute.xlu0 %1243 }
 0x31b   :  { %v1245_v25 = vsel %vm430_vm2, %v2934_v51, %v1242_v57  ;;  %v1246_v22 = vsel %vm430_vm2, %v1242_v57, %v1244_v20  ;;  %v1325_v51 = vsel %vm74_vm9, %v1321_v13, 0.0 }
 0x31c   :  { %v1249_v0 = vadd.f32 %v1245_v25, %v1224_v8  ;;  %v1250_v24 = vadd.f32 %v1246_v22, %v1225_v26  ;;  %v1334_v54 = vmul.f32 %v2930_v36, %v1325_v51  ;;  %v1549_v25 = vmul.f32 %v2928_v45, %v1541_v19 }
 0x31e   :  { %v1272_v53 = vadd.f32 %v1270_v63, %v1249_v0  ;;  %v1273_v38 = vadd.f32 %v1271_v34, %v1250_v24  ;;  %v1461_v8 = vpop.permute.xlu1 %1460  ;;  %v1463_v9 = vpop.permute.xlu0 %1462  ;;  %v3179_v63 = vunpack.i.l.bf16 %v2948_v6  ;;  %v1347_v34 = vsel %vm59_vm5, %v1343_v55, 0.0 }
 0x31f   :  { %v1464_v31 = vsel %vm430_vm2, %v2932_v28, %v1461_v8  ;;  %v1465_v47 = vsel %vm430_vm2, %v1461_v8, %v1463_v9  ;;  %v3180_v28 = vunpack.i.h.bf16 %v2948_v6  ;;  %v3181_v6 = vunpack.i.l.bf16 %v2950_v10 }
 0x320   :  { %v1295_v27 = vadd.f32 %v1293_v44, %v1272_v53  ;;  %v1296_v16 = vadd.f32 %v1294_v56, %v1273_v38  ;;  %v1468_v26 = vadd.f32 %v1464_v31, %v1444_v35  ;;  %v1469_v11 = vadd.f32 %v1465_v47, %v1445_v43 }
 0x321   :  { %v1344_v1 = vsel %vm762_vm15, %v2973_v7, %v3179_v63  ;;  %v1559_v30 = vsel %vm762_vm15, %v3006_v61, %v3180_v28  ;;  %v1540_v7 = vsel %vm73_vm10, %v1536_v37, 0.0  ;;  %v3182_v24 = vunpack.i.h.bf16 %v2950_v10 }
 0x322   :  { %v1490_v44 = vadd.f32 %v1488_v12, %v1468_v26  ;;  %v1491_v35 = vadd.f32 %v1489_v52, %v1469_v11  ;;  %v1378_v46 = vpop.permute.xlu1 %1377  ;;  %v1386_v13 = vpop.permute.xlu0 %1385  ;;  %v1307_v57 = vadd.f32 %v2986_v42, %v1296_v16  ;;  %v1306_v20 = vadd.f32 %v2990_v14, %v1295_v27 }
 0x323   :  { %v1392_v12 = vsel %vm916_vm1, %v2975_v58, %v3181_v6  ;;  %v1348_v42 = vsel %vm60_vm4, %v1344_v1, 0.0  ;;  %v1563_v0 = vsel %vm60_vm4, %v1559_v30, 0.0  ;;  %v1605_v43 = vsel %vm916_vm1, %v3008_v59, %v3182_v24 }
 0x324   :  { %v1512_v22 = vadd.f32 %v1510_v4, %v1490_v44  ;;  %v1513_v14 = vadd.f32 %v1511_v60, %v1491_v35  ;;  %v1396_v48 = vsel %vm74_vm9, %v1392_v12, 0.0  ;;  %v1336_v56 = vadd.f32 %v1334_v54, %v1307_v57 }
 0x325   :  { %v1548_v17 = vmul.f32 %v2928_v45, %v1540_v7  ;;  %v1357_v61 = vmul.f32 %v2936_v62, %v1348_v42  ;;  %v1562_v10 = vsel %vm59_vm5, %v1558_v39, 0.0  ;;  %v1571_v53 = vmul.f32 %v2938_v3, %v1563_v0  ;;  %v3185_v0 = vld [vmem:[#allocation12_spill] sm:$0xff] }
 0x326   :  { %v1599_v4 = vpop.permute.xlu1 %1598  ;;  %v1591_v60 = vpop.permute.xlu0 %1590  ;;  %v1523_v51 = vadd.f32 %v3012_v49, %v1513_v14  ;;  %v1522_v23 = vadd.f32 %v2999_v41, %v1512_v22  ;;  %v1609_v38 = vsel %vm74_vm9, %v1605_v43, 0.0  ;;  %v1356_v49 = vmul.f32 %v2936_v62, %v1347_v34  ;;  %v3184_v34 = vld [vmem:[#allocation10_spill] sm:$0xff] }
 0x327   :  { %v1405_v9 = vmul.f32 %v2940_v2, %v1396_v48  ;;  %v1391_v36 = vsel %vm916_vm1, %v1386_v13, %v2975_v58  ;;  %v1604_v45 = vsel %vm916_vm1, %v1599_v4, %v3008_v59  ;;  %v1359_v18 = vadd.f32 %v1357_v61, %v1336_v56 }
 0x328   :  { %v1551_v8 = vadd.f32 %v1549_v25, %v1523_v51  ;;  %v1550_v31 = vadd.f32 %v1548_v17, %v1522_v23  ;;  %v1335_v47 = vadd.f32 %v1333_v33, %v1306_v20  ;;  %v1570_v40 = vmul.f32 %v2938_v3, %v1562_v10  ;;  %v3183_v25 = vld [vmem:[#allocation11_spill] sm:$0xff] }
 0x329   :  { %v1617_v27 = vmul.f32 %v2944_v5, %v1609_v38  ;;  %v1395_v58 = vsel %vm73_vm10, %v1391_v36, 0.0  ;;  %v1608_v59 = vsel %vm73_vm10, %v1604_v45, 0.0 }
 0x32a   :  { %v1589_v41 = vpop.permute.xlu1 %1588  ;;  %v1573_v52 = vadd.f32 %v1571_v53, %v1551_v8  ;;  %v1376_v37 = vpop.permute.xlu0 %1375  ;;  %v1572_v63 = vadd.f32 %v1570_v40, %v1550_v31  ;;  %v1358_v28 = vadd.f32 %v1356_v49, %v1335_v47  ;;  %v1404_v30 = vmul.f32 %v2940_v2, %v1395_v58 }
 0x32b   :  { %v1593_v62 = vsel %vm843_vm0, %v1589_v41, %v1591_v60  ;;  %v1380_v16 = vsel %vm843_vm0, %v1376_v37, %v1378_v46  ;;  %v1616_v44 = vmul.f32 %v2944_v5, %v1608_v59 }
 0x32c   :  { %v1597_v26 = vadd.f32 %v1593_v62, %v1573_v52  ;;  %v1384_v11 = vadd.f32 %v1380_v16, %v1359_v18 }
 0x32e   :  { %v1619_v19 = vadd.f32 %v1617_v27, %v1597_v26  ;;  %v1407_v55 = vadd.f32 %v1405_v9, %v1384_v11  ;;  %v1587_v1 = vpop.permute.xlu1 %1586  ;;  %v1374_v3 = vpop.permute.xlu0 %1373 }
 0x32f   :  { %v1592_v35 = vsel %vm843_vm0, %v1587_v1, %v1589_v41  ;;  %v1379_v46 = vsel %vm843_vm0, %v1374_v3, %v1376_v37 }
 0x330   :  { %v1596_v13 = vadd.f32 %v1592_v35, %v1572_v63  ;;  %v1383_v57 = vadd.f32 %v1379_v46, %v1358_v28  ;;  %v1415_v50 = vadd.f32 %v2952_v21, %v1407_v55  ;;  %v1627_v20 = vadd.f32 %v2946_v15, %v1619_v19 }
 0x332   :  { %v1618_v29 = vadd.f32 %v1616_v44, %v1596_v13  ;;  %v1406_v54 = vadd.f32 %v1404_v30, %v1383_v57  ;;  %v1417_v7 = vmax.f32 %v1415_v50, 0.0  ;;  %v1629_v6 = vmax.f32 %v1627_v20, 0.0 }
 0x334   :  { %v1626_v12 = vadd.f32 %v2946_v15, %v1618_v29  ;;  %v1414_v2 = vadd.f32 %v2952_v21, %v1406_v54  ;;  %v1992_v5 = vpack.c.bf16 %v1417_v7, %v3183_v25  ;;  %v1996_v42 = vpack.c.bf16 %v1629_v6, %v2845_v32  ;;  %v1632_v15 = vld [vmem:[%s3162_s6] sm:$0xff]  ;;  %s2290_s6 = scalar_lea.vmem %s1807_s2, 512 }
 0x335   :  { %p2291_p0 = scmp.ne.s32.totalorder %s1807_s2, %s2290_s6  ;;  %p2296_p2 = scmp.lt.s32.totalorder %s2290_s6, %s2290_s6 }
 0x336   :  { %v1628_v22 = vmax.f32 %v1626_v12, 0.0  ;;  %v1416_v14 = vmax.f32 %v1414_v2, 0.0  ;;  %1993 = vmatprep.subr.bf16.mxu0 %v1992_v5  ;;  %1997 = vmatprep.subr.bf16.mxu1 %v1996_v42 }
 0x337   :  { %p2297_p3 = por %p2296_p2, %p2295_p1 }
 0x338   :  { %v1994_v39 = vpack.c.bf16 %v1416_v14, %v3184_v34  ;;  %v1998_v24 = vpack.c.bf16 %v1628_v22, %v3185_v0 }
 0x339   :  { %p2298_p4 = pnand %p2297_p3, %p2291_p0 }
 0x33a   :  { %1995 = vmatpush1.bf16.msra.mxu0 %v1994_v39  ;;  %1999 = vmatpush1.bf16.msra.mxu1 %v1998_v24 }
 0x33d   :  { %1846 = vmatmul.mubr.msk.f32.vlgmr.msra.gmra.mrb[4].mxu0 %vm430_vm2, %v1632_v15  ;;  %1847 = vmatmul.mubr.msk.f32.vlgmr.msra.gmra.mrb[4].mxu1 %vm430_vm2, %v1632_v15 }
 0x33f   :  { %v1790_v21 = vpop.permute.xlu0 %1789 }
 0x410   :  { %v1710_v32 = vpop.f32.mrb[4].mxu0  ;;  %v1781_v43 = vpop.f32.mrb[4].mxu1 }
 0x411   :  { %v1792_v48 = vadd.f32 %v1790_v21, %v1710_v32  ;;  %v1794_v4 = vadd.f32 %v1790_v21, %v1781_v43  ;;  %v1712_v60 = vpop.f32.mrb[5].mxu0  ;;  %v1783_v51 = vpop.f32.mrb[5].mxu1 }
 0x412   :  { %v1793_v56 = vadd.f32 %v1790_v21, %v1712_v60  ;;  %v1795_v23 = vadd.f32 %v1790_v21, %v1783_v51 }
 0x413   :  { %1796 = vst [vmem:[#allocation7] sm:$0xff] %v1792_v48  ;;  %1799 = vst [vmem:[#allocation7 + $0x10] sm:$0xff] %v1794_v4 }
 0x414   :  { %1797 = vst [vmem:[#allocation7 + $0x8] sm:$0xff] %v1793_v56  ;;  %1800 = vst [vmem:[#allocation7 + $0x18] sm:$0xff] %v1795_v23 }
 0x415   :  { %2301 = shalt.err (!%p2298_p4)
}
 0x416   :  { %s2302_s21 = scalar_lea.hbm %s3164_s8, 512 }
 0x417   :  { %p2303_p5 = scmp.ne.s32.totalorder %s3164_s8, %s2302_s21  ;;  %p2306_p6 = scmp.lt.u32.totalorder %s2302_s21, %s3164_s8 }
 0x419   :  { %p2308_p7 = pnand %p2306_p6, %p2303_p5 }
 0x41b   :  { %2311 = shalt.err (!%p2308_p7)
}
 0x41c   :  { %s2325_s0 = smov 256  }
 0x41d   :  { %1812 = dma.vmem_to_hbm [thread:$0]  %s1807_s2, 512, %s3164_s8, [#allocation8], %s2325_s0, %s2325_s0, %s2317_s17  }
 0x41e   :  { %2312 = dma.done.wait [#allocation8], 512  }
 0x41f   :  { %2313 = vsyncadd [#allocation8], 4294966784 }
 0x420   :  { %1816 = vsyncpa [#allocation8], 1 }

</bundles_post_ra>
